<compile_context>
chip_gen: v6e
topology: v6e:2x2x1
jax: 0.10.0
libtpu: 0.0.40
codegen_flags: <defaults>
</compile_context>

<pallas_src>
import functools

import jax
import jax.numpy as jnp
import numpy as np
from jax.experimental import pallas as pl
from jax.experimental.pallas import tpu as pltpu

EPS = 1e-5

# Matmul operand dtype.  f32 keeps strict parity with the f32 reference; set
# to jnp.bfloat16 on v6e / v7x for ~2x MXU throughput (loosen the test
# tolerance to ~3e-2 in that case; accumulation / BN stats remain f32).
MATMUL_DTYPE = jnp.float32

VMEM_LIMIT_BYTES = 32 * 1024 * 1024


# --------------------------------------------------------------------------
# Single fused kernel: conv1(3x3) + conv_id(1x1) + BN1 + ReLU + conv2(3x3)
#                      + BN2 + BN_id + add + ReLU.
# --------------------------------------------------------------------------
def _fused_double_conv_kernel(xim_ref, wcat_ref, bcat_ref, sdn_ref, sup_ref,
                              t2_ref, b2_ref, bnp_ref, p_ref, out_ref,
                              *, wc, inv_cnt):
    f32 = jnp.float32

    def bn_scale_shift(y, g_row, b_row):
        # per-lane sums (XLU), then per-channel fold + broadcast in one
        # matmul with the 0/1 matrix P[i, j] = (i % Cout == j % Cout).
        s = jnp.sum(y, axis=0, keepdims=True)                      # (1, WC)
        q = jnp.sum(y * y, axis=0, keepdims=True)                  # (1, WC)
        mean = jnp.dot(s, p_ref[...], preferred_element_type=f32) * inv_cnt
        ex2 = jnp.dot(q, p_ref[...], preferred_element_type=f32) * inv_cnt
        # biased variance, clamped >= 0 (E[x^2]-E[x]^2 cancellation guard)
        var = jnp.maximum(ex2 - mean * mean, 0.0)
        scale = g_row * jax.lax.rsqrt(var + EPS)
        shift = b_row - mean * scale
        return scale, shift

    # conv1 (block-Toeplitz, K = 3*W*Cin) and identity 1x1 conv fused into a
    # single MXU dot; output columns [0, WC) = conv1, [WC, 2*WC) = identity.
    y_all = jnp.dot(xim_ref[...], wcat_ref[...],
                    preferred_element_type=f32) + bcat_ref[...]    # (NH, 2*WC)
    y1 = y_all[:, :wc]
    yid = y_all[:, wc:]

    # BN1 + ReLU (lane-dense VPU work)
    sc1, sh1 = bn_scale_shift(y1, bnp_ref[0:1, :], bnp_ref[1:2, :])
    z = jnp.maximum(y1 * sc1 + sh1, 0.0)                           # (NH, WC)

    # conv2: H-halo shifts (with batch-boundary zeros) via 0/1 shift-matrix
    # multiplies, then one K = 3*WC dot.  No sublane-misaligned slices.
    zc = z.astype(sdn_ref.dtype)
    zd = jnp.dot(sdn_ref[...], zc, preferred_element_type=f32)     # z[h-1]
    zu = jnp.dot(sup_ref[...], zc, preferred_element_type=f32)     # z[h+1]
    zim = jnp.concatenate([zd.astype(t2_ref.dtype),
                           zc.astype(t2_ref.dtype),
                           zu.astype(t2_ref.dtype)], axis=1)       # (NH, 3*WC)
    y2 = jnp.dot(zim, t2_ref[...], preferred_element_type=f32) + b2_ref[...]

    # BN_id, BN2, residual add, ReLU
    sci, shi = bn_scale_shift(yid, bnp_ref[2:3, :], bnp_ref[3:4, :])
    sc2, sh2 = bn_scale_shift(y2, bnp_ref[4:5, :], bnp_ref[5:6, :])
    out_ref[...] = jnp.maximum((y2 * sc2 + sh2) + (yid * sci + shi), 0.0)


# --------------------------------------------------------------------------
# Wrapper-side helpers (plain JAX / numpy glue, runs once inside jit).
# --------------------------------------------------------------------------
def _toeplitz_3x3(w_oihw, W):
    """(Cout, Cin, 3, 3) -> (3, W*Cin, W*Cout); W zero-padding folded in."""
    mats = []
    for dy in range(3):
        t = None
        for dx in range(3):
            shift = jnp.eye(W, W, k=-(dx - 1), dtype=jnp.float32)
            blk = jnp.kron(shift, w_oihw[:, :, dy, dx].T.astype(jnp.float32))
            t = blk if t is None else t + blk
        mats.append(t)
    return jnp.stack(mats, axis=0)


def _toeplitz_1x1(w_oi, W):
    """(Cout, Cin) -> (W*Cin, W*Cout) block diagonal."""
    return jnp.kron(jnp.eye(W, dtype=jnp.float32), w_oi.T.astype(jnp.float32))


def _tile_row(v, W):
    """Per-channel vector (C,) -> lane-dense row (1, W*C) matching the slab."""
    return jnp.tile(v.astype(jnp.float32), W).reshape(1, -1)


@jax.jit
def double_conv_pallas(x_nchw, p):
    N, Cin, H, W = x_nchw.shape
    Cout = p["w1"].shape[0]
    WC = W * Cout
    WCI = W * Cin
    NH = N * H
    cnt = N * H * W

    # ---- layout: NCHW -> lane-dense (N*H, W*Cin) slab, im2col along H -----
    x_slab = jnp.transpose(x_nchw, (0, 2, 3, 1)).astype(jnp.float32)
    x_slab = x_slab.reshape(N, H, WCI)
    xp = jnp.pad(x_slab, ((0, 0), (1, 1), (0, 0)))            # (N, H+2, WCI)
    xim = jnp.concatenate([xp[:, 0:H], xp[:, 1:H + 1], xp[:, 2:H + 2]],
                          axis=2).reshape(NH, 3 * WCI)
    xim = xim.astype(MATMUL_DTYPE)

    # ---- weights: stacked Toeplitz, identity conv fused into conv1 dot ----
    t1s = _toeplitz_3x3(p["w1"], W).reshape(3 * WCI, WC)       # (3*WCI, WC)
    tid = _toeplitz_1x1(p["wi"].reshape(Cout, Cin), W)         # (WCI, WC)
    wid = jnp.concatenate([jnp.zeros((WCI, WC), jnp.float32), tid,
                           jnp.zeros((WCI, WC), jnp.float32)], axis=0)
    wcat = jnp.concatenate([t1s, wid], axis=1).astype(MATMUL_DTYPE)
    t2s = _toeplitz_3x3(p["w2"], W).reshape(3 * WC, WC).astype(MATMUL_DTYPE)

    bcat = jnp.concatenate([_tile_row(p["b1"], W), _tile_row(p["bi"], W)],
                           axis=1)                             # (1, 2*WC)
    b2 = _tile_row(p["b2"], W)                                 # (1, WC)

    # packed BN affine params: rows [g1, be1, gi, bei, g2, be2, 0, 0]
    bnp = jnp.concatenate(
        [_tile_row(p["g1"], W), _tile_row(p["be1"], W),
         _tile_row(p["gi"], W), _tile_row(p["bei"], W),
         _tile_row(p["g2"], W), _tile_row(p["be2"], W),
         jnp.zeros((2, WC), jnp.float32)], axis=0)             # (8, WC)

    # H-shift matrices with batch-boundary zeros (trace-time constants)
    r = np.arange(NH)
    sdn_np = np.zeros((NH, NH), np.float32)
    m = (r % H) != 0
    sdn_np[r[m], r[m] - 1] = 1.0
    sup_np = np.zeros((NH, NH), np.float32)
    m = (r % H) != (H - 1)
    sup_np[r[m], r[m] + 1] = 1.0
    sdn = jnp.asarray(sdn_np).astype(MATMUL_DTYPE)
    sup = jnp.asarray(sup_np).astype(MATMUL_DTYPE)

    # per-channel fold + broadcast matrix P[i, j] = (i % Cout == j % Cout)
    pmat = jnp.asarray(np.kron(np.ones((W, W), np.float32),
                               np.eye(Cout, dtype=np.float32)))

    kernel = functools.partial(_fused_double_conv_kernel,
                               wc=WC, inv_cnt=1.0 / cnt)

    # Single grid step over the whole batch: all operands fit easily in VMEM
    # at decoder-tile sizes like this one (~0.6 MiB total here).
    out_slab = pl.pallas_call(
        kernel,
        out_shape=jax.ShapeDtypeStruct((NH, WC), jnp.float32),
        compiler_params=pltpu.CompilerParams(
            vmem_limit_bytes=VMEM_LIMIT_BYTES),
    )(xim, wcat, bcat, sdn, sup, t2s, b2, bnp, pmat)

    out = out_slab.reshape(N, H, W, Cout)
    return jnp.transpose(out, (0, 3, 1, 2))                    # back to NCHW


# ---------------------------- pure-JAX reference ----------------------------
def double_conv_ref(x, p):
    def conv(x, w, b, pad):
        y = jax.lax.conv_general_dilated(
            x, w, (1, 1), [(pad, pad), (pad, pad)],
            dimension_numbers=("NCHW", "OIHW", "NCHW"))
        return y + b[None, :, None, None]

    def bn(x, g, b):
        m = jnp.mean(x, axis=(0, 2, 3), keepdims=True)
        v = jnp.mean((x - m) ** 2, axis=(0, 2, 3), keepdims=True)
        return ((x - m) * jax.lax.rsqrt(v + EPS) * g[None, :, None, None]
                + b[None, :, None, None])

    y = conv(x, p["w1"], p["b1"], 1)
    y = jnp.maximum(bn(y, p["g1"], p["be1"]), 0.0)
    y = conv(y, p["w2"], p["b2"], 1)
    y = bn(y, p["g2"], p["be2"])
    ident = bn(conv(x, p["wi"], p["bi"], 0), p["gi"], p["bei"])
    return jnp.maximum(y + ident, 0.0)


def init_params(key, cin, cout):
    ks = jax.random.split(key, 12)
    s1 = 1.0 / np.sqrt(cin * 9)
    s2 = 1.0 / np.sqrt(cout * 9)
    si = 1.0 / np.sqrt(cin * 1)
    return {
        "w1": jax.random.uniform(ks[0], (cout, cin, 3, 3), jnp.float32, -s1, s1),
        "b1": jax.random.uniform(ks[1], (cout,), jnp.float32, -s1, s1),
        "g1": 1.0 + 0.1 * jax.random.normal(ks[2], (cout,), jnp.float32),
        "be1": 0.1 * jax.random.normal(ks[3], (cout,), jnp.float32),
        "w2": jax.random.uniform(ks[4], (cout, cout, 3, 3), jnp.float32, -s2, s2),
        "b2": jax.random.uniform(ks[5], (cout,), jnp.float32, -s2, s2),
        "g2": 1.0 + 0.1 * jax.random.normal(ks[6], (cout,), jnp.float32),
        "be2": 0.1 * jax.random.normal(ks[7], (cout,), jnp.float32),
        "wi": jax.random.uniform(ks[8], (cout, cin, 1, 1), jnp.float32, -si, si),
        "bi": jax.random.uniform(ks[9], (cout,), jnp.float32, -si, si),
        "gi": 1.0 + 0.1 * jax.random.normal(ks[10], (cout,), jnp.float32),
        "bei": 0.1 * jax.random.normal(ks[11], (cout,), jnp.float32),
    }


if __name__ == "__main__":
    N, Cin, Cout, H, W = 2, 4, 8, 16, 16
    key = jax.random.PRNGKey(0)
    kx, kp = jax.random.split(key)
    x = jax.random.normal(kx, (N, Cin, H, W), jnp.float32)
    params = init_params(kp, Cin, Cout)

    out = jax.block_until_ready(double_conv_pallas(x, params))
    ref = jax.block_until_ready(double_conv_ref(x, params))

    assert out.shape == (N, Cout, H, W)
    np.testing.assert_allclose(np.asarray(out), np.asarray(ref),
                               rtol=2e-3, atol=2e-3)
    print("KERNEL_OK")
</pallas_src>

<mosaic_0001>
module attributes {stable_mosaic.version = 11 : i64} {
  func.func @_fused_double_conv_kernel(%arg0: memref<32x192xf32, #tpu.memory_space<vmem>>, %arg1: memref<192x256xf32, #tpu.memory_space<vmem>>, %arg2: memref<1x256xf32, #tpu.memory_space<vmem>>, %arg3: memref<32x32xf32, #tpu.memory_space<vmem>>, %arg4: memref<32x32xf32, #tpu.memory_space<vmem>>, %arg5: memref<384x128xf32, #tpu.memory_space<vmem>>, %arg6: memref<1x128xf32, #tpu.memory_space<vmem>>, %arg7: memref<8x128xf32, #tpu.memory_space<vmem>>, %arg8: memref<128x128xf32, #tpu.memory_space<vmem>>, %arg9: memref<32x128xf32, #tpu.memory_space<vmem>>) attributes {dimension_semantics = [], scalar_prefetch = 0 : i64, scratch_operands = 0 : i64, tpu.core_type = #tpu.core_type<tc>} {
    %c0 = arith.constant 0 : index
    %c0_0 = arith.constant 0 : index
    %0 = vector.load %arg0[%c0, %c0_0] : memref<32x192xf32, #tpu.memory_space<vmem>>, vector<32x192xf32>
    %c0_1 = arith.constant 0 : index
    %c0_2 = arith.constant 0 : index
    %1 = vector.load %arg1[%c0_1, %c0_2] : memref<192x256xf32, #tpu.memory_space<vmem>>, vector<192x256xf32>
    %cst = arith.constant dense<0.000000e+00> : vector<32x256xf32>
    %2 = tpu.matmul %0, %1, %cst {dimension_numbers = #tpu.dot_dimension_numbers<[1], [0], [0], [1], [0, 0, 1, 1], [], []>} : vector<32x192xf32>, vector<192x256xf32>, vector<32x256xf32> -> vector<32x256xf32>
    %c0_3 = arith.constant 0 : index
    %c0_4 = arith.constant 0 : index
    %3 = vector.load %arg2[%c0_3, %c0_4] : memref<1x256xf32, #tpu.memory_space<vmem>>, vector<1x256xf32>
    %4 = vector.broadcast %3 : vector<1x256xf32> to vector<32x256xf32>
    %5 = arith.addf %2, %4 : vector<32x256xf32>
    %6 = vector.extract_strided_slice %5 {offsets = [0, 0], sizes = [32, 128], strides = [1, 1]} : vector<32x256xf32> to vector<32x128xf32>
    %7 = vector.extract_strided_slice %5 {offsets = [0, 128], sizes = [32, 128], strides = [1, 1]} : vector<32x256xf32> to vector<32x128xf32>
    %c0_5 = arith.constant 0 : index
    %c0_6 = arith.constant 0 : index
    %8 = vector.load %arg7[%c0_5, %c0_6] : memref<8x128xf32, #tpu.memory_space<vmem>>, vector<1x128xf32>
    %c1 = arith.constant 1 : index
    %c0_7 = arith.constant 0 : index
    %9 = vector.load %arg7[%c1, %c0_7] : memref<8x128xf32, #tpu.memory_space<vmem>>, vector<1x128xf32>
    %cst_8 = arith.constant dense<0.000000e+00> : vector<128xf32>
    %10 = vector.multi_reduction <add>, %6, %cst_8 [0] : vector<32x128xf32> to vector<128xf32>
    %11 = vector.shape_cast %10 : vector<128xf32> to vector<1x128xf32>
    %12 = arith.mulf %6, %6 : vector<32x128xf32>
    %cst_9 = arith.constant dense<0.000000e+00> : vector<128xf32>
    %13 = vector.multi_reduction <add>, %12, %cst_9 [0] : vector<32x128xf32> to vector<128xf32>
    %14 = vector.shape_cast %13 : vector<128xf32> to vector<1x128xf32>
    %c0_10 = arith.constant 0 : index
    %c0_11 = arith.constant 0 : index
    %15 = vector.load %arg8[%c0_10, %c0_11] : memref<128x128xf32, #tpu.memory_space<vmem>>, vector<128x128xf32>
    %cst_12 = arith.constant dense<0.000000e+00> : vector<1x128xf32>
    %16 = tpu.matmul %11, %15, %cst_12 {dimension_numbers = #tpu.dot_dimension_numbers<[1], [0], [0], [1], [0, 0, 1, 1], [], []>} : vector<1x128xf32>, vector<128x128xf32>, vector<1x128xf32> -> vector<1x128xf32>
    %cst_13 = arith.constant 0.001953125 : f32
    %17 = vector.broadcast %cst_13 : f32 to vector<1x128xf32>
    %18 = arith.mulf %16, %17 : vector<1x128xf32>
    %c0_14 = arith.constant 0 : index
    %c0_15 = arith.constant 0 : index
    %19 = vector.load %arg8[%c0_14, %c0_15] : memref<128x128xf32, #tpu.memory_space<vmem>>, vector<128x128xf32>
    %cst_16 = arith.constant dense<0.000000e+00> : vector<1x128xf32>
    %20 = tpu.matmul %14, %19, %cst_16 {dimension_numbers = #tpu.dot_dimension_numbers<[1], [0], [0], [1], [0, 0, 1, 1], [], []>} : vector<1x128xf32>, vector<128x128xf32>, vector<1x128xf32> -> vector<1x128xf32>
    %cst_17 = arith.constant 0.001953125 : f32
    %21 = vector.broadcast %cst_17 : f32 to vector<1x128xf32>
    %22 = arith.mulf %20, %21 : vector<1x128xf32>
    %23 = arith.mulf %18, %18 : vector<1x128xf32>
    %24 = arith.subf %22, %23 : vector<1x128xf32>
    %cst_18 = arith.constant 0.000000e+00 : f32
    %25 = vector.broadcast %cst_18 : f32 to vector<1x128xf32>
    %26 = arith.maximumf %24, %25 : vector<1x128xf32>
    %cst_19 = arith.constant 9.99999974E-6 : f32
    %27 = vector.broadcast %cst_19 : f32 to vector<1x128xf32>
    %28 = arith.addf %26, %27 : vector<1x128xf32>
    %29 = math.rsqrt %28 : vector<1x128xf32>
    %30 = arith.mulf %8, %29 : vector<1x128xf32>
    %31 = arith.mulf %18, %30 : vector<1x128xf32>
    %32 = arith.subf %9, %31 : vector<1x128xf32>
    %33 = vector.broadcast %30 : vector<1x128xf32> to vector<32x128xf32>
    %34 = arith.mulf %6, %33 : vector<32x128xf32>
    %35 = vector.broadcast %32 : vector<1x128xf32> to vector<32x128xf32>
    %36 = arith.addf %34, %35 : vector<32x128xf32>
    %cst_20 = arith.constant 0.000000e+00 : f32
    %37 = vector.broadcast %cst_20 : f32 to vector<32x128xf32>
    %38 = arith.maximumf %36, %37 : vector<32x128xf32>
    %c0_21 = arith.constant 0 : index
    %c0_22 = arith.constant 0 : index
    %39 = vector.load %arg3[%c0_21, %c0_22] : memref<32x32xf32, #tpu.memory_space<vmem>>, vector<32x32xf32>
    %cst_23 = arith.constant dense<0.000000e+00> : vector<32x128xf32>
    %40 = tpu.matmul %39, %38, %cst_23 {dimension_numbers = #tpu.dot_dimension_numbers<[1], [0], [0], [1], [0, 0, 1, 1], [], []>} : vector<32x32xf32>, vector<32x128xf32>, vector<32x128xf32> -> vector<32x128xf32>
    %c0_24 = arith.constant 0 : index
    %c0_25 = arith.constant 0 : index
    %41 = vector.load %arg4[%c0_24, %c0_25] : memref<32x32xf32, #tpu.memory_space<vmem>>, vector<32x32xf32>
    %cst_26 = arith.constant dense<0.000000e+00> : vector<32x128xf32>
    %42 = tpu.matmul %41, %38, %cst_26 {dimension_numbers = #tpu.dot_dimension_numbers<[1], [0], [0], [1], [0, 0, 1, 1], [], []>} : vector<32x32xf32>, vector<32x128xf32>, vector<32x128xf32> -> vector<32x128xf32>
    %43 = tpu.concatenate %40, %38, %42 in 1 : vector<32x128xf32>, vector<32x128xf32>, vector<32x128xf32> -> vector<32x384xf32>
    %c0_27 = arith.constant 0 : index
    %c0_28 = arith.constant 0 : index
    %44 = vector.load %arg5[%c0_27, %c0_28] : memref<384x128xf32, #tpu.memory_space<vmem>>, vector<384x128xf32>
    %cst_29 = arith.constant dense<0.000000e+00> : vector<32x128xf32>
    %45 = tpu.matmul %43, %44, %cst_29 {dimension_numbers = #tpu.dot_dimension_numbers<[1], [0], [0], [1], [0, 0, 1, 1], [], []>} : vector<32x384xf32>, vector<384x128xf32>, vector<32x128xf32> -> vector<32x128xf32>
    %c0_30 = arith.constant 0 : index
    %c0_31 = arith.constant 0 : index
    %46 = vector.load %arg6[%c0_30, %c0_31] : memref<1x128xf32, #tpu.memory_space<vmem>>, vector<1x128xf32>
    %47 = vector.broadcast %46 : vector<1x128xf32> to vector<32x128xf32>
    %48 = arith.addf %45, %47 : vector<32x128xf32>
    %c2 = arith.constant 2 : index
    %c0_32 = arith.constant 0 : index
    %49 = vector.load %arg7[%c2, %c0_32] : memref<8x128xf32, #tpu.memory_space<vmem>>, vector<1x128xf32>
    %c3 = arith.constant 3 : index
    %c0_33 = arith.constant 0 : index
    %50 = vector.load %arg7[%c3, %c0_33] : memref<8x128xf32, #tpu.memory_space<vmem>>, vector<1x128xf32>
    %cst_34 = arith.constant dense<0.000000e+00> : vector<128xf32>
    %51 = vector.multi_reduction <add>, %7, %cst_34 [0] : vector<32x128xf32> to vector<128xf32>
    %52 = vector.shape_cast %51 : vector<128xf32> to vector<1x128xf32>
    %53 = arith.mulf %7, %7 : vector<32x128xf32>
    %cst_35 = arith.constant dense<0.000000e+00> : vector<128xf32>
    %54 = vector.multi_reduction <add>, %53, %cst_35 [0] : vector<32x128xf32> to vector<128xf32>
    %55 = vector.shape_cast %54 : vector<128xf32> to vector<1x128xf32>
    %c0_36 = arith.constant 0 : index
    %c0_37 = arith.constant 0 : index
    %56 = vector.load %arg8[%c0_36, %c0_37] : memref<128x128xf32, #tpu.memory_space<vmem>>, vector<128x128xf32>
    %cst_38 = arith.constant dense<0.000000e+00> : vector<1x128xf32>
    %57 = tpu.matmul %52, %56, %cst_38 {dimension_numbers = #tpu.dot_dimension_numbers<[1], [0], [0], [1], [0, 0, 1, 1], [], []>} : vector<1x128xf32>, vector<128x128xf32>, vector<1x128xf32> -> vector<1x128xf32>
    %cst_39 = arith.constant 0.001953125 : f32
    %58 = vector.broadcast %cst_39 : f32 to vector<1x128xf32>
    %59 = arith.mulf %57, %58 : vector<1x128xf32>
    %c0_40 = arith.constant 0 : index
    %c0_41 = arith.constant 0 : index
    %60 = vector.load %arg8[%c0_40, %c0_41] : memref<128x128xf32, #tpu.memory_space<vmem>>, vector<128x128xf32>
    %cst_42 = arith.constant dense<0.000000e+00> : vector<1x128xf32>
    %61 = tpu.matmul %55, %60, %cst_42 {dimension_numbers = #tpu.dot_dimension_numbers<[1], [0], [0], [1], [0, 0, 1, 1], [], []>} : vector<1x128xf32>, vector<128x128xf32>, vector<1x128xf32> -> vector<1x128xf32>
    %cst_43 = arith.constant 0.001953125 : f32
    %62 = vector.broadcast %cst_43 : f32 to vector<1x128xf32>
    %63 = arith.mulf %61, %62 : vector<1x128xf32>
    %64 = arith.mulf %59, %59 : vector<1x128xf32>
    %65 = arith.subf %63, %64 : vector<1x128xf32>
    %cst_44 = arith.constant 0.000000e+00 : f32
    %66 = vector.broadcast %cst_44 : f32 to vector<1x128xf32>
    %67 = arith.maximumf %65, %66 : vector<1x128xf32>
    %cst_45 = arith.constant 9.99999974E-6 : f32
    %68 = vector.broadcast %cst_45 : f32 to vector<1x128xf32>
    %69 = arith.addf %67, %68 : vector<1x128xf32>
    %70 = math.rsqrt %69 : vector<1x128xf32>
    %71 = arith.mulf %49, %70 : vector<1x128xf32>
    %72 = arith.mulf %59, %71 : vector<1x128xf32>
    %73 = arith.subf %50, %72 : vector<1x128xf32>
    %c4 = arith.constant 4 : index
    %c0_46 = arith.constant 0 : index
    %74 = vector.load %arg7[%c4, %c0_46] : memref<8x128xf32, #tpu.memory_space<vmem>>, vector<1x128xf32>
    %c5 = arith.constant 5 : index
    %c0_47 = arith.constant 0 : index
    %75 = vector.load %arg7[%c5, %c0_47] : memref<8x128xf32, #tpu.memory_space<vmem>>, vector<1x128xf32>
    %cst_48 = arith.constant dense<0.000000e+00> : vector<128xf32>
    %76 = vector.multi_reduction <add>, %48, %cst_48 [0] : vector<32x128xf32> to vector<128xf32>
    %77 = vector.shape_cast %76 : vector<128xf32> to vector<1x128xf32>
    %78 = arith.mulf %48, %48 : vector<32x128xf32>
    %cst_49 = arith.constant dense<0.000000e+00> : vector<128xf32>
    %79 = vector.multi_reduction <add>, %78, %cst_49 [0] : vector<32x128xf32> to vector<128xf32>
    %80 = vector.shape_cast %79 : vector<128xf32> to vector<1x128xf32>
    %c0_50 = arith.constant 0 : index
    %c0_51 = arith.constant 0 : index
    %81 = vector.load %arg8[%c0_50, %c0_51] : memref<128x128xf32, #tpu.memory_space<vmem>>, vector<128x128xf32>
    %cst_52 = arith.constant dense<0.000000e+00> : vector<1x128xf32>
    %82 = tpu.matmul %77, %81, %cst_52 {dimension_numbers = #tpu.dot_dimension_numbers<[1], [0], [0], [1], [0, 0, 1, 1], [], []>} : vector<1x128xf32>, vector<128x128xf32>, vector<1x128xf32> -> vector<1x128xf32>
    %cst_53 = arith.constant 0.001953125 : f32
    %83 = vector.broadcast %cst_53 : f32 to vector<1x128xf32>
    %84 = arith.mulf %82, %83 : vector<1x128xf32>
    %c0_54 = arith.constant 0 : index
    %c0_55 = arith.constant 0 : index
    %85 = vector.load %arg8[%c0_54, %c0_55] : memref<128x128xf32, #tpu.memory_space<vmem>>, vector<128x128xf32>
    %cst_56 = arith.constant dense<0.000000e+00> : vector<1x128xf32>
    %86 = tpu.matmul %80, %85, %cst_56 {dimension_numbers = #tpu.dot_dimension_numbers<[1], [0], [0], [1], [0, 0, 1, 1], [], []>} : vector<1x128xf32>, vector<128x128xf32>, vector<1x128xf32> -> vector<1x128xf32>
    %cst_57 = arith.constant 0.001953125 : f32
    %87 = vector.broadcast %cst_57 : f32 to vector<1x128xf32>
    %88 = arith.mulf %86, %87 : vector<1x128xf32>
    %89 = arith.mulf %84, %84 : vector<1x128xf32>
    %90 = arith.subf %88, %89 : vector<1x128xf32>
    %cst_58 = arith.constant 0.000000e+00 : f32
    %91 = vector.broadcast %cst_58 : f32 to vector<1x128xf32>
    %92 = arith.maximumf %90, %91 : vector<1x128xf32>
    %cst_59 = arith.constant 9.99999974E-6 : f32
    %93 = vector.broadcast %cst_59 : f32 to vector<1x128xf32>
    %94 = arith.addf %92, %93 : vector<1x128xf32>
    %95 = math.rsqrt %94 : vector<1x128xf32>
    %96 = arith.mulf %74, %95 : vector<1x128xf32>
    %97 = arith.mulf %84, %96 : vector<1x128xf32>
    %98 = arith.subf %75, %97 : vector<1x128xf32>
    %99 = vector.broadcast %96 : vector<1x128xf32> to vector<32x128xf32>
    %100 = arith.mulf %48, %99 : vector<32x128xf32>
    %101 = vector.broadcast %98 : vector<1x128xf32> to vector<32x128xf32>
    %102 = arith.addf %100, %101 : vector<32x128xf32>
    %103 = vector.broadcast %71 : vector<1x128xf32> to vector<32x128xf32>
    %104 = arith.mulf %7, %103 : vector<32x128xf32>
    %105 = vector.broadcast %73 : vector<1x128xf32> to vector<32x128xf32>
    %106 = arith.addf %104, %105 : vector<32x128xf32>
    %107 = arith.addf %102, %106 : vector<32x128xf32>
    %cst_60 = arith.constant 0.000000e+00 : f32
    %108 = vector.broadcast %cst_60 : f32 to vector<32x128xf32>
    %109 = arith.maximumf %107, %108 : vector<32x128xf32>
    %c0_61 = arith.constant 0 : index
    %c0_62 = arith.constant 0 : index
    %110 = vector.load %arg9[%c0_61, %c0_62] : memref<32x128xf32, #tpu.memory_space<vmem>>, vector<32x128xf32>
    tpu.vector_store %arg9[%c0_61, %c0_62], %109 {strides = array<i32>} : memref<32x128xf32, #tpu.memory_space<vmem>>, vector<32x128xf32>,
    return
  }
}

</mosaic_0001>

<bundles_post_ra>
// kernel: tile.63
= control target key start
LH: loop header
LB: loop body
LE: loop exit
PB: predicated region body
PF: predicated region fallthrough
CT: control target
= control target key end

     0   :  { %s28_s0 = inlined_call_operand.vmem [shape: f32[8], index: 0, kind: input, shape index: {}]   ;;  %s29_s1 = inlined_call_operand.vmem [shape: f32[16,8], index: 1, kind: output, shape index: {}]  }
   0x1   :  { %v4_v0 = vld [vmem:[%s28_s0] ss:$0 sm:$0xff] }
   0x2   :  { %5 = vst [vmem:[%s29_s1] sm:$0xff] %v4_v0  ;;  %8 = vst [vmem:[%s29_s1 + $0x8] sm:$0xff] %v4_v0 }

// kernel: tile.64
= control target key start
LH: loop header
LB: loop body
LE: loop exit
PB: predicated region body
PF: predicated region fallthrough
CT: control target
= control target key end

     0   :  { %s133_s10 = smov 120   ;;  %s134_s11 = smov 104   ;;  %vm3_vm0 = vcmask 64512   ;;  %vm9_vm1 = vcmask 1048512   ;;  %vm15_vm2 = vcmask 982912   ;;  %vm21_vm3 = vcmask 917312   ;;  %s209_s0 = inlined_call_operand.vmem [shape: f32[16,8], index: 0, kind: input, shape index: {}]   ;;  %s210_s1 = inlined_call_operand.vmem [shape: f32[1,128], index: 1, kind: output, shape index: {}]  }
   0x1   :  { %v103_v0 = vld [vmem:[%s209_s0 + $0xf] sm:$0x1]   ;;  %v105_v1 = vld [vmem:[%s209_s0 + $0xd] sm:$0x1]   ;;  %v104_v2 = vld [vmem:[%s209_s0 + $0xe] sm:$0x1]  }
   0x2   :  { %7 = vrot.lane.b32.xlu0 %v103_v0, %s133_s10  ;;  %19 = vrot.lane.b32.xlu1 %v105_v1, %s134_s11  ;;  %v106_v3 = vld [vmem:[%s209_s0 + $0xc] sm:$0x1]   ;;  %s135_s16 = smov 112   ;;  %s136_s17 = smov 96   ;;  %v107_v4 = vld [vmem:[%s209_s0 + $0xb] sm:$0x1]  }
   0x3   :  { %v108_v5 = vld [vmem:[%s209_s0 + $0xa] sm:$0x1]   ;;  %v2_v6 = vld [vmem:[%s209_s0] sm:$0x1]   ;;  %s137_s24 = smov 88   ;;  %s138_s25 = smov 80  }
   0x4   :  { %4 = vst.msk [vmem:[#allocation0] sm:$0x1] %vm3_vm0, %v2_v6   ;;  %v109_v7 = vld [vmem:[%s209_s0 + $0x9] sm:$0x1]   ;;  %v110_v8 = vld [vmem:[%s209_s0 + $0x8] sm:$0x1]  }
   0x5   :  { %s139_s30 = smov 72   ;;  %s140_s2 = smov 64   ;;  %v111_v9 = vld [vmem:[%s209_s0 + $0x7] sm:$0x1]   ;;  %v112_v10 = vld [vmem:[%s209_s0 + $0x6] sm:$0x1]  }
   0x6   :  { %13 = vrot.lane.b32.xlu0 %v104_v2, %s135_s16  ;;  %25 = vrot.lane.b32.xlu1 %v106_v3, %s136_s17  ;;  %s141_s7 = smov 56   ;;  %s142_s8 = smov 48   ;;  %v113_v11 = vld [vmem:[%s209_s0 + $0x5] sm:$0x1]   ;;  %v114_v12 = vld [vmem:[%s209_s0 + $0x4] sm:$0x1]  }
   0x7   :  { %s143_s13 = smov 40   ;;  %s144_s14 = smov 32   ;;  %v115_v13 = vld [vmem:[%s209_s0 + $0x3] sm:$0x1]   ;;  %v116_v14 = vld [vmem:[%s209_s0 + $0x2] sm:$0x1]  }
   0x8   :  { %s145_s19 = smov 24   ;;  %s146_s20 = smov 16   ;;  %v117_v15 = vld [vmem:[%s209_s0 + $0x1] sm:$0x1]   ;;  %vm27_vm4 = vcmask 851712   ;;  %vm33_vm5 = vcmask 786112  }
   0x9   :  { %s147_s0 = smov 8   ;;  %vm39_vm6 = vcmask 720512   ;;  %vm45_vm7 = vcmask 654912   ;;  %vm51_vm8 = vcmask 589312   ;;  %vm57_vm9 = vcmask 523712  }
   0xa   :  { %31 = vrot.lane.b32.xlu0 %v107_v4, %s137_s24  ;;  %37 = vrot.lane.b32.xlu1 %v108_v5, %s138_s25  ;;  %vm63_vm10 = vcmask 458112   ;;  %vm69_vm11 = vcmask 392512   ;;  %vm75_vm12 = vcmask 326912   ;;  %vm81_vm13 = vcmask 261312  }
   0xb   :  { %vm87_vm14 = vcmask 195712   ;;  %vm93_vm15 = vcmask 130112  }
   0xe   :  { %43 = vrot.lane.b32.xlu0 %v109_v7, %s139_s30  ;;  %49 = vrot.lane.b32.xlu1 %v110_v8, %s140_s2 }
  0x12   :  { %55 = vrot.lane.b32.xlu0 %v111_v9, %s141_s7  ;;  %61 = vrot.lane.b32.xlu1 %v112_v10, %s142_s8 }
  0x16   :  { %67 = vrot.lane.b32.xlu0 %v113_v11, %s143_s13  ;;  %73 = vrot.lane.b32.xlu1 %v114_v12, %s144_s14 }
  0x1a   :  { %79 = vrot.lane.b32.xlu0 %v115_v13, %s145_s19  ;;  %85 = vrot.lane.b32.xlu1 %v116_v14, %s146_s20 }
  0x1e   :  { %91 = vrot.lane.b32.xlu0 %v117_v15, %s147_s0 }
  0x74   :  { %v8_v16 = vpop.permute.xlu0 %7   ;;  %v20_v17 = vpop.permute.xlu1 %19  }
  0x75   :  { %10 = vst.msk [vmem:[#allocation0] sm:$0x1] %vm9_vm1, %v8_v16  }
  0x78   :  { %v14_v18 = vpop.permute.xlu0 %13   ;;  %v26_v19 = vpop.permute.xlu1 %25  }
  0x79   :  { %16 = vst.msk [vmem:[#allocation0] sm:$0x1] %vm15_vm2, %v14_v18  }
  0x7a   :  { %22 = vst.msk [vmem:[#allocation0] sm:$0x1] %vm21_vm3, %v20_v17  }
  0x7b   :  { %28 = vst.msk [vmem:[#allocation0] sm:$0x1] %vm27_vm4, %v26_v19  }
  0x7c   :  { %v32_v20 = vpop.permute.xlu0 %31   ;;  %v38_v21 = vpop.permute.xlu1 %37  }
  0x7d   :  { %34 = vst.msk [vmem:[#allocation0] sm:$0x1] %vm33_vm5, %v32_v20  }
  0x7e   :  { %40 = vst.msk [vmem:[#allocation0] sm:$0x1] %vm39_vm6, %v38_v21  }
  0x80   :  { %v44_v22 = vpop.permute.xlu0 %43   ;;  %v50_v23 = vpop.permute.xlu1 %49  }
  0x81   :  { %46 = vst.msk [vmem:[#allocation0] sm:$0x1] %vm45_vm7, %v44_v22  }
  0x82   :  { %52 = vst.msk [vmem:[#allocation0] sm:$0x1] %vm51_vm8, %v50_v23  }
  0x84   :  { %v56_v24 = vpop.permute.xlu0 %55   ;;  %v62_v25 = vpop.permute.xlu1 %61  }
  0x85   :  { %58 = vst.msk [vmem:[#allocation0] sm:$0x1] %vm57_vm9, %v56_v24  }
  0x86   :  { %64 = vst.msk [vmem:[#allocation0] sm:$0x1] %vm63_vm10, %v62_v25  }
  0x88   :  { %v68_v26 = vpop.permute.xlu0 %67   ;;  %v74_v27 = vpop.permute.xlu1 %73  }
  0x89   :  { %70 = vst.msk [vmem:[#allocation0] sm:$0x1] %vm69_vm11, %v68_v26  }
  0x8a   :  { %76 = vst.msk [vmem:[#allocation0] sm:$0x1] %vm75_vm12, %v74_v27  }
  0x8c   :  { %v80_v28 = vpop.permute.xlu0 %79   ;;  %v86_v29 = vpop.permute.xlu1 %85  }
  0x8d   :  { %82 = vst.msk [vmem:[#allocation0] sm:$0x1] %vm81_vm13, %v80_v28  }
  0x8e   :  { %88 = vst.msk [vmem:[#allocation0] sm:$0x1] %vm87_vm14, %v86_v29  }
  0x90   :  { %v92_v30 = vpop.permute.xlu0 %91  }
  0x91   :  { %94 = vst.msk [vmem:[#allocation0] sm:$0x1] %vm93_vm15, %v92_v30  }
  0x98   :  { %v99_v31 = vld [vmem:[#allocation0] sm:$0x1] }
  0x99   :  { %102 = vst [vmem:[%s210_s1] sm:$0x1] %v99_v31 }

// kernel: double_conv_pallas.1
= control target key start
LH: loop header
LB: loop body
LE: loop exit
PB: predicated region body
PF: predicated region fallthrough
CT: control target
= control target key end

     0   :  { %v1715_v3 = vmov 0.0   ;;  %vm100_vm0 = vcmask 523264   ;;  %vm1716_vm1 = vmmov 0   ;;  %vm416_vm2 = vcmask 261120   ;;  %s2554_s1 = inlined_call_operand.vmem [shape: f32[192,256], index: 1, kind: input, shape index: {}]   ;;  %s2555_s0 = inlined_call_operand.vmem [shape: f32[32,192], index: 0, kind: input, shape index: {}]   ;;  %s2556_s8 = inlined_call_operand.vmem [shape: f32[128,128], index: 8, kind: input, shape index: {}]   ;;  %s2557_s2 = inlined_call_operand.vmem [shape: f32[1,256], index: 2, kind: input, shape index: {}]   ;;  %s2558_s3 = inlined_call_operand.vmem [shape: f32[32,32], index: 3, kind: input, shape index: {}]   ;;  %s2559_s5 = inlined_call_operand.vmem [shape: f32[384,128], index: 5, kind: input, shape index: {}]   ;;  %s2560_s7 = inlined_call_operand.vmem [shape: f32[8,128], index: 7, kind: input, shape index: {}]   ;;  %s2561_s4 = inlined_call_operand.vmem [shape: f32[32,32], index: 4, kind: input, shape index: {}]   ;;  %s2562_s6 = inlined_call_operand.vmem [shape: f32[1,128], index: 6, kind: input, shape index: {}]   ;;  %s2563_s9 = inlined_call_operand.vmem [shape: f32[32,128], index: 9, kind: output, shape index: {}]  }
   0x1   :  { %v71_v0 = vld [vmem:[%s2554_s1 + $0xf8] sm:$0xff]  ;;  %v70_v1 = vld [vmem:[%s2554_s1 + $0xf0] sm:$0xff]  ;;  %v69_v2 = vld [vmem:[%s2554_s1 + $0xe8] sm:$0xff]  ;;  %1431 = vmatprep.subr.mxu1 %v1715_v3  ;;  %1463 = vmatprep.mubr.msk.f32.mxu1 %vm1716_vm1, %v1715_v3 }
   0x2   :  { %113 = vmatprep.subr.mxu0 %v71_v0  ;;  %v68_v4 = vld [vmem:[%s2554_s1 + $0xe0] sm:$0xff]  ;;  %v67_v5 = vld [vmem:[%s2554_s1 + $0xd8] sm:$0xff]  ;;  %v66_v6 = vld [vmem:[%s2554_s1 + $0xd0] sm:$0xff] }
   0x3   :  { %114 = vmatpush1.msra.mxu0 %v70_v1  ;;  %v65_v7 = vld [vmem:[%s2554_s1 + $0xc8] sm:$0xff]  ;;  %v64_v8 = vld [vmem:[%s2554_s1 + $0xc0] sm:$0xff]  ;;  %v63_v9 = vld [vmem:[%s2554_s1 + $0xb8] sm:$0xff] }
   0x4   :  { %115 = vmatprep.subr.mxu0 %v69_v2  ;;  %v62_v10 = vld [vmem:[%s2554_s1 + $0xb0] sm:$0xff]  ;;  %v61_v11 = vld [vmem:[%s2554_s1 + $0xa8] sm:$0xff]  ;;  %v60_v12 = vld [vmem:[%s2554_s1 + $0xa0] sm:$0xff] }
   0x5   :  { %116 = vmatpush1.msra.mxu0 %v68_v4  ;;  %v59_v13 = vld [vmem:[%s2554_s1 + $0x98] sm:$0xff]  ;;  %v58_v14 = vld [vmem:[%s2554_s1 + $0x90] sm:$0xff]  ;;  %v57_v15 = vld [vmem:[%s2554_s1 + $0x88] sm:$0xff] }
   0x6   :  { %117 = vmatprep.subr.mxu0 %v67_v5  ;;  %v56_v16 = vld [vmem:[%s2554_s1 + $0x80] sm:$0xff]  ;;  %v55_v17 = vld [vmem:[%s2554_s1 + $0x78] sm:$0xff]  ;;  %v54_v18 = vld [vmem:[%s2554_s1 + $0x70] sm:$0xff] }
   0x7   :  { %118 = vmatpush1.msra.mxu0 %v66_v6  ;;  %v53_v19 = vld [vmem:[%s2554_s1 + $0x68] sm:$0xff]  ;;  %v52_v21 = vld [vmem:[%s2554_s1 + $0x60] sm:$0xff]  ;;  %v51_v22 = vld [vmem:[%s2554_s1 + $0x58] sm:$0xff] }
   0x8   :  { %119 = vmatprep.subr.mxu0 %v65_v7  ;;  %v33_v20 = vld [vmem:[%s2555_s0 + $0x8] sm:$0xff]  ;;  %v1838_v23 = vld [vmem:[%s2556_s8 + $0x78] sm:$0xff]  ;;  %v50_v24 = vld [vmem:[%s2554_s1 + $0x50] sm:$0xff] }
   0x9   :  { %120 = vmatpush1.msra.mxu0 %v64_v8  ;;  %1236 = vmatprep.mubr.msk.f32.mxu0 %vm100_vm0, %v33_v20  ;;  %v1847_v25 = vld [vmem:[%s2556_s8 + $0x70] sm:$0xff]  ;;  %v49_v26 = vld [vmem:[%s2554_s1 + $0x48] sm:$0xff]  ;;  %v48_v27 = vld [vmem:[%s2554_s1 + $0x40] sm:$0xff] }
   0xa   :  { %121 = vmatprep.subr.mxu0 %v63_v9  ;;  %1432 = vmatpush3.msra.mxu1 %v1838_v23  ;;  %v47_v28 = vld [vmem:[%s2554_s1 + $0x38] sm:$0xff]  ;;  %v46_v29 = vld [vmem:[%s2554_s1 + $0x30] sm:$0xff]  ;;  %v45_v30 = vld [vmem:[%s2554_s1 + $0x28] sm:$0xff] }
   0xb   :  { %122 = vmatpush1.msra.mxu0 %v62_v10  ;;  %1433 = vmatprep.subr.mxu1 %v1715_v3  ;;  %v44_v31 = vld [vmem:[%s2554_s1 + $0x20] sm:$0xff]  ;;  %v43_v32 = vld [vmem:[%s2554_s1 + $0x18] sm:$0xff]  ;;  %v42_v33 = vld [vmem:[%s2554_s1 + $0x10] sm:$0xff]  ;;  %v90_v10 = vlaneseq }
   0xc   :  { %123 = vmatprep.subr.mxu0 %v61_v11  ;;  %1434 = vmatpush3.msra.mxu1 %v1847_v25  ;;  %v41_v34 = vld [vmem:[%s2554_s1 + $0x8] sm:$0xff]  ;;  %v40_v35 = vld [vmem:[%s2554_s1] sm:$0xff]  ;;  %v87_v36 = vld [vmem:[%s2554_s1 + $0x178] sm:$0xff] }
   0xd   :  { %124 = vmatpush1.msra.mxu0 %v60_v12  ;;  %1435 = vmatprep.subr.mxu1 %v1715_v3  ;;  %v86_v37 = vld [vmem:[%s2554_s1 + $0x170] sm:$0xff]  ;;  %v85_v38 = vld [vmem:[%s2554_s1 + $0x168] sm:$0xff]  ;;  %v84_v39 = vld [vmem:[%s2554_s1 + $0x160] sm:$0xff]  ;;  %v2054_v11 = vshrl.u32 %v90_v10, 7 }
   0xe   :  { %125 = vmatprep.subr.mxu0 %v59_v13  ;;  %v83_v40 = vld [vmem:[%s2554_s1 + $0x158] sm:$0xff]  ;;  %v82_v41 = vld [vmem:[%s2554_s1 + $0x150] sm:$0xff]  ;;  %v81_v42 = vld [vmem:[%s2554_s1 + $0x148] sm:$0xff] }
   0xf   :  { %126 = vmatpush1.msra.mxu0 %v58_v14  ;;  %v80_v43 = vld [vmem:[%s2554_s1 + $0x140] sm:$0xff]  ;;  %v79_v44 = vld [vmem:[%s2554_s1 + $0x138] sm:$0xff]  ;;  %v78_v45 = vld [vmem:[%s2554_s1 + $0x130] sm:$0xff]  ;;  %v2057_v13 = vsub.s32 0, %v2054_v11 }
  0x10   :  { %127 = vmatprep.subr.mxu0 %v57_v15  ;;  %v77_v46 = vld [vmem:[%s2554_s1 + $0x128] sm:$0xff]  ;;  %v76_v47 = vld [vmem:[%s2554_s1 + $0x120] sm:$0xff]  ;;  %v75_v48 = vld [vmem:[%s2554_s1 + $0x118] sm:$0xff] }
  0x11   :  { %128 = vmatpush1.msra.mxu0 %v56_v16  ;;  %v74_v49 = vld [vmem:[%s2554_s1 + $0x110] sm:$0xff]  ;;  %v73_v50 = vld [vmem:[%s2554_s1 + $0x108] sm:$0xff]  ;;  %v72_v51 = vld [vmem:[%s2554_s1 + $0x100] sm:$0xff] }
  0x12   :  { %129 = vmatprep.subr.mxu0 %v55_v17  ;;  %v32_v52 = vld [vmem:[%s2555_s0] sm:$0xff]  ;;  %v35_v53 = vld [vmem:[%s2555_s0 + $0x18] sm:$0xff]  ;;  %v34_v54 = vld [vmem:[%s2555_s0 + $0x10] sm:$0xff] }
  0x13   :  { %130 = vmatpush1.msra.mxu0 %v54_v18  ;;  %v37_v55 = vld [vmem:[%s2555_s0 + $0x28] sm:$0xff]  ;;  %v36_v56 = vld [vmem:[%s2555_s0 + $0x20] sm:$0xff]  ;;  %v39_v57 = vld [vmem:[%s2555_s0 + $0x38] sm:$0xff] }
  0x14   :  { %131 = vmatprep.subr.mxu0 %v53_v19  ;;  %v38_v58 = vld [vmem:[%s2555_s0 + $0x30] sm:$0xff]  ;;  %v1957_v59 = vld [vmem:[%s2556_s8 + $0x68] sm:$0xff]  ;;  %v1964_v60 = vld [vmem:[%s2556_s8 + $0x60] sm:$0xff] }
  0x15   :  { %132 = vmatpush1.msra.mxu0 %v52_v21  ;;  %1436 = vmatpush3.msra.mxu1 %v1957_v59  ;;  %v1971_v61 = vld [vmem:[%s2556_s8 + $0x58] sm:$0xff]  ;;  %v1978_v62 = vld [vmem:[%s2556_s8 + $0x50] sm:$0xff]  ;;  %v1985_v63 = vld [vmem:[%s2556_s8 + $0x48] sm:$0xff] }
  0x16   :  { %133 = vmatprep.subr.mxu0 %v51_v22  ;;  %1437 = vmatprep.subr.mxu1 %v1715_v3  ;;  %v1992_v0 = vld [vmem:[%s2556_s8 + $0x40] sm:$0xff]  ;;  %v1999_v1 = vld [vmem:[%s2556_s8 + $0x38] sm:$0xff]  ;;  %v2006_v2 = vld [vmem:[%s2556_s8 + $0x30] sm:$0xff] }
  0x17   :  { %134 = vmatpush1.msra.mxu0 %v50_v24  ;;  %1438 = vmatpush3.msra.mxu1 %v1964_v60  ;;  %v2013_v4 = vld [vmem:[%s2556_s8 + $0x28] sm:$0xff]  ;;  %v2020_v5 = vld [vmem:[%s2556_s8 + $0x20] sm:$0xff]  ;;  %v2027_v6 = vld [vmem:[%s2556_s8 + $0x18] sm:$0xff] }
  0x18   :  { %135 = vmatprep.subr.mxu0 %v49_v26  ;;  %1439 = vmatprep.subr.mxu1 %v1715_v3  ;;  %v2034_v7 = vld [vmem:[%s2556_s8 + $0x10] sm:$0xff]  ;;  %v2041_v8 = vld [vmem:[%s2556_s8 + $0x8] sm:$0xff]  ;;  %v2048_v9 = vld [vmem:[%s2556_s8] sm:$0xff] }
  0x19   :  { %136 = vmatpush1.msra.mxu0 %v48_v27  ;;  %1440 = vmatpush3.msra.mxu1 %v1971_v61  ;;  %v2062_v14 = vld [vmem:[%s2557_s2] sm:$0x3]  ;;  %v642_v10 = vld [vmem:[%s2559_s5 + $0xd8] sm:$0xff] }
  0x1a   :  { %137 = vmatprep.subr.mxu0 %v47_v28  ;;  %1441 = vmatprep.subr.mxu1 %v1715_v3  ;;  %v93_v17 = vrot.slane %v2062_v14, %v2057_v13 }
  0x1b   :  { %138 = vmatpush1.msra.mxu0 %v46_v29  ;;  %1442 = vmatpush3.msra.mxu1 %v1978_v62 }
  0x1c   :  { %139 = vmatprep.subr.mxu0 %v45_v30  ;;  %1443 = vmatprep.subr.mxu1 %v1715_v3 }
  0x1d   :  { %140 = vmatpush1.msra.mxu0 %v44_v31  ;;  %1444 = vmatpush3.msra.mxu1 %v1985_v63 }
  0x1e   :  { %141 = vmatprep.subr.mxu0 %v43_v32  ;;  %1445 = vmatprep.subr.mxu1 %v1715_v3 }
  0x1f   :  { %142 = vmatpush1.msra.mxu0 %v42_v33  ;;  %1446 = vmatpush3.msra.mxu1 %v1992_v0 }
  0x20   :  { %143 = vmatprep.subr.mxu0 %v41_v34  ;;  %1447 = vmatprep.subr.mxu1 %v1715_v3 }
  0x21   :  { %144 = vmatpush1.msra.mxu0 %v40_v35  ;;  %1448 = vmatpush3.msra.mxu1 %v1999_v1 }
  0x22   :  { %161 = vmatprep.subr.mxu0 %v87_v36  ;;  %1449 = vmatprep.subr.mxu1 %v1715_v3 }
  0x23   :  { %162 = vmatpush2.msra.mxu0 %v86_v37  ;;  %1450 = vmatpush3.msra.mxu1 %v2006_v2 }
  0x24   :  { %163 = vmatprep.subr.mxu0 %v85_v38  ;;  %1451 = vmatprep.subr.mxu1 %v1715_v3 }
  0x25   :  { %164 = vmatpush2.msra.mxu0 %v84_v39  ;;  %1452 = vmatpush3.msra.mxu1 %v2013_v4 }
  0x26   :  { %165 = vmatprep.subr.mxu0 %v83_v40  ;;  %1453 = vmatprep.subr.mxu1 %v1715_v3 }
  0x27   :  { %166 = vmatpush2.msra.mxu0 %v82_v41  ;;  %1454 = vmatpush3.msra.mxu1 %v2020_v5 }
  0x28   :  { %167 = vmatprep.subr.mxu0 %v81_v42  ;;  %1455 = vmatprep.subr.mxu1 %v1715_v3 }
  0x29   :  { %168 = vmatpush2.msra.mxu0 %v80_v43  ;;  %1456 = vmatpush3.msra.mxu1 %v2027_v6 }
  0x2a   :  { %169 = vmatprep.subr.mxu0 %v79_v44  ;;  %1457 = vmatprep.subr.mxu1 %v1715_v3 }
  0x2b   :  { %170 = vmatpush2.msra.mxu0 %v78_v45  ;;  %1458 = vmatpush3.msra.mxu1 %v2034_v7 }
  0x2c   :  { %171 = vmatprep.subr.mxu0 %v77_v46  ;;  %1459 = vmatprep.subr.mxu1 %v1715_v3 }
  0x2d   :  { %172 = vmatpush2.msra.mxu0 %v76_v47  ;;  %1460 = vmatpush3.msra.mxu1 %v2041_v8 }
  0x2e   :  { %173 = vmatprep.subr.mxu0 %v75_v48  ;;  %1461 = vmatprep.subr.mxu1 %v1715_v3 }
  0x2f   :  { %174 = vmatpush2.msra.mxu0 %v74_v49  ;;  %1462 = vmatpush3.msra.mxu1 %v2048_v9 }
  0x30   :  { %175 = vmatprep.subr.mxu0 %v73_v50  ;;  %1466 = vmatprep.subr.mxu1 %v1715_v3  ;;  %v412_v50 = vld [vmem:[%s2558_s3] sm:$0xff] }
  0x31   :  { %176 = vmatpush2.msra.mxu0 %v72_v51  ;;  %v646_v51 = vld [vmem:[%s2559_s5 + $0xf8] sm:$0xff] }
  0x32   :  { %178 = vmatmul.mubr.f32.vlgmr.msra.gmra.mxu0 %v32_v52  ;;  %v630_v52 = vld [vmem:[%s2559_s5 + $0x78] sm:$0xff] }
  0x33   :  { %1237 = vmatprep.mubr.msk.f32.mxu0 %vm100_vm0, %v35_v53  ;;  %v645_v53 = vld [vmem:[%s2559_s5 + $0xf0] sm:$0xff] }
  0x36   :  { %184 = vmatmul.mubr.f32.gmra.mxu0 %v34_v54  ;;  %v629_v54 = vld [vmem:[%s2559_s5 + $0x70] sm:$0xff] }
  0x37   :  { %1238 = vmatprep.mubr.msk.f32.mxu0 %vm100_vm0, %v37_v55  ;;  %v644_v55 = vld [vmem:[%s2559_s5 + $0xe8] sm:$0xff] }
  0x3a   :  { %190 = vmatmul.mubr.f32.gmra.mxu0 %v36_v56  ;;  %v628_v56 = vld [vmem:[%s2559_s5 + $0x68] sm:$0xff] }
  0x3b   :  { %1239 = vmatprep.mubr.msk.f32.mxu0 %vm100_vm0, %v39_v57  ;;  %v643_v57 = vld [vmem:[%s2559_s5 + $0xe0] sm:$0xff] }
  0x3e   :  { %196 = vmatmul.mubr.f32.gmra.mxu0 %v38_v58  ;;  %v627_v58 = vld [vmem:[%s2559_s5 + $0x60] sm:$0xff] }
  0x3f   :  { %1509 = vmatprep.mubr.msk.f32.mxu0 %vm416_vm2, %v412_v50 }
  0xf2   :  { %v179_v12 = vpop.f32.mrf.mxu0 }
  0xf3   :  { %v2072_v21 = vadd.f32 %v179_v12, %v93_v17  ;;  %v626_v12 = vld [vmem:[%s2559_s5 + $0x58] sm:$0xff] }
  0xf4   :  { %v2064_v15 = vpop.f32.mrf.mxu0 }
  0xf5   :  { %v213_v38 = vmul.f32 %v2072_v21, %v2072_v21 }
  0xf6   :  { %v185_v16 = vpop.f32.mrf.mxu0 }
  0xf7   :  { %v2070_v19 = vadd.f32 %v185_v16, %v93_v17  ;;  %v641_v16 = vld [vmem:[%s2559_s5 + $0xd0] sm:$0xff] }
  0xf8   :  { %v2068_v18 = vpop.f32.mrf.mxu0 }
  0xf9   :  { %v204_v26 = vadd.f32 %v2070_v19, %v2072_v21  ;;  %v214_v36 = vmul.f32 %v2070_v19, %v2070_v19 }
  0xfa   :  { %v191_v20 = vpop.f32.mrf.mxu0 }
  0xfb   :  { %v2074_v22 = vadd.f32 %v191_v20, %v93_v17  ;;  %v217_v40 = vadd.f32 %v214_v36, %v213_v38  ;;  %v640_v20 = vld [vmem:[%s2559_s5 + $0xc8] sm:$0xff]  ;;  %v635_v36 = vld [vmem:[%s2559_s5 + $0xa0] sm:$0xff]  ;;  %v634_v38 = vld [vmem:[%s2559_s5 + $0x98] sm:$0xff] }
  0xfc   :  { %v2076_v24 = vpop.f32.mrf.mxu0 }
  0xfd   :  { %v205_v28 = vadd.f32 %v204_v26, %v2074_v22  ;;  %v215_v39 = vmul.f32 %v2074_v22, %v2074_v22  ;;  %v624_v26 = vld [vmem:[%s2559_s5 + $0x48] sm:$0xff] }
  0xfe   :  { %v197_v27 = vpop.f32.mrf.mxu0 }
  0xff   :  { %v2081_v29 = vadd.f32 %v197_v27, %v93_v17  ;;  %v218_v42 = vadd.f32 %v217_v40, %v215_v39  ;;  %v625_v17 = vld [vmem:[%s2559_s5 + $0x50] sm:$0xff]  ;;  %v639_v27 = vld [vmem:[%s2559_s5 + $0xc0] sm:$0xff]  ;;  %v618_v39 = vld [vmem:[%s2559_s5 + $0x18] sm:$0xff] }
 0x100   :  { %v633_v40 = vld [vmem:[%s2559_s5 + $0x90] sm:$0xff] }
 0x101   :  { %v206_v30 = vadd.f32 %v205_v28, %v2081_v29  ;;  %v216_v41 = vmul.f32 %v2081_v29, %v2081_v29  ;;  %v623_v28 = vld [vmem:[%s2559_s5 + $0x40] sm:$0xff] }
 0x103   :  { %v207_v31 = vrot.slane %v206_v30, 4  ;;  %v219_v43 = vadd.f32 %v218_v42, %v216_v41  ;;  %v617_v41 = vld [vmem:[%s2559_s5 + $0x10] sm:$0xff]  ;;  %v632_v42 = vld [vmem:[%s2559_s5 + $0x88] sm:$0xff] }
 0x105   :  { %v208_v32 = vadd.f32 %v207_v31, %v206_v30  ;;  %v220_v44 = vrot.slane %v219_v43, 4  ;;  %v638_v30 = vld [vmem:[%s2559_s5 + $0xb8] sm:$0xff] }
 0x106   :  { %v622_v31 = vld [vmem:[%s2559_s5 + $0x38] sm:$0xff] }
 0x107   :  { %v209_v33 = vrot.slane %v208_v32, 2  ;;  %v221_v45 = vadd.f32 %v220_v44, %v219_v43  ;;  %v616_v43 = vld [vmem:[%s2559_s5 + $0x8] sm:$0xff] }
 0x109   :  { %v210_v34 = vadd.f32 %v209_v33, %v208_v32  ;;  %v222_v46 = vrot.slane %v221_v45, 2  ;;  %v637_v32 = vld [vmem:[%s2559_s5 + $0xb0] sm:$0xff] }
 0x10a   :  { %v621_v33 = vld [vmem:[%s2559_s5 + $0x30] sm:$0xff] }
 0x10b   :  { %v211_v35 = vrot.slane %v210_v34, 1  ;;  %v223_v47 = vadd.f32 %v222_v46, %v221_v45 }
 0x10d   :  { %v212_v37 = vadd.f32 %v211_v35, %v210_v34  ;;  %v224_v48 = vrot.slane %v223_v47, 1  ;;  %v636_v34 = vld [vmem:[%s2559_s5 + $0xa8] sm:$0xff] }
 0x10e   :  { %v620_v35 = vld [vmem:[%s2559_s5 + $0x28] sm:$0xff] }
 0x10f   :  { %1464 = vmatmul.mubr.f32.vlgmr.msra.gmra.mxu1 %v212_v37  ;;  %v225_v49 = vadd.f32 %v224_v48, %v223_v47  ;;  %v619_v37 = vld [vmem:[%s2559_s5 + $0x20] sm:$0xff] }
 0x110   :  { %1467 = vmatpush3.msra.mxu1 %v1838_v23  ;;  %1498 = vmatprep.mubr.msk.f32.mxu1 %vm1716_vm1, %v1715_v3 }
 0x111   :  { %1468 = vmatprep.subr.mxu1 %v1715_v3 }
 0x112   :  { %1469 = vmatpush3.msra.mxu1 %v1847_v25 }
 0x113   :  { %1470 = vmatprep.subr.mxu1 %v1715_v3 }
 0x114   :  { %1471 = vmatpush3.msra.mxu1 %v1957_v59 }
 0x115   :  { %1472 = vmatprep.subr.mxu1 %v1715_v3 }
 0x116   :  { %1473 = vmatpush3.msra.mxu1 %v1964_v60 }
 0x117   :  { %1474 = vmatprep.subr.mxu1 %v1715_v3 }
 0x118   :  { %1475 = vmatpush3.msra.mxu1 %v1971_v61 }
 0x119   :  { %1476 = vmatprep.subr.mxu1 %v1715_v3 }
 0x11a   :  { %1477 = vmatpush3.msra.mxu1 %v1978_v62 }
 0x11b   :  { %1478 = vmatprep.subr.mxu1 %v1715_v3 }
 0x11c   :  { %1479 = vmatpush3.msra.mxu1 %v1985_v63 }
 0x11d   :  { %1480 = vmatprep.subr.mxu1 %v1715_v3 }
 0x11e   :  { %1481 = vmatpush3.msra.mxu1 %v1992_v0 }
 0x11f   :  { %1482 = vmatprep.subr.mxu1 %v1715_v3 }
 0x120   :  { %1483 = vmatpush3.msra.mxu1 %v1999_v1 }
 0x121   :  { %1484 = vmatprep.subr.mxu1 %v1715_v3 }
 0x122   :  { %1485 = vmatpush3.msra.mxu1 %v2006_v2 }
 0x123   :  { %1486 = vmatprep.subr.mxu1 %v1715_v3 }
 0x124   :  { %1487 = vmatpush3.msra.mxu1 %v2013_v4 }
 0x125   :  { %1488 = vmatprep.subr.mxu1 %v1715_v3 }
 0x126   :  { %1489 = vmatpush3.msra.mxu1 %v2020_v5 }
 0x127   :  { %1490 = vmatprep.subr.mxu1 %v1715_v3 }
 0x128   :  { %1491 = vmatpush3.msra.mxu1 %v2027_v6 }
 0x129   :  { %1492 = vmatprep.subr.mxu1 %v1715_v3 }
 0x12a   :  { %1493 = vmatpush3.msra.mxu1 %v2034_v7 }
 0x12b   :  { %1494 = vmatprep.subr.mxu1 %v1715_v3 }
 0x12c   :  { %1495 = vmatpush3.msra.mxu1 %v2041_v8 }
 0x12d   :  { %1496 = vmatprep.subr.mxu1 %v1715_v3 }
 0x12e   :  { %1497 = vmatpush3.msra.mxu1 %v2048_v9 }
 0x12f   :  { %1499 = vmatmul.mubr.f32.vlgmr.msra.gmra.mxu1 %v225_v49  ;;  %1299 = vmatprep.subr.mxu1 %v646_v51 }
 0x130   :  { %1300 = vmatpush3.msra.mxu1 %v630_v52 }
 0x131   :  { %1301 = vmatprep.subr.mxu1 %v645_v53 }
 0x132   :  { %1302 = vmatpush3.msra.mxu1 %v629_v54  ;;  %v202_v54 = vld [vmem:[%s2560_s7] sm:$0x1] }
 0x133   :  { %1303 = vmatprep.subr.mxu1 %v644_v55 }
 0x134   :  { %1304 = vmatpush3.msra.mxu1 %v628_v56 }
 0x135   :  { %1305 = vmatprep.subr.mxu1 %v643_v57  ;;  %v203_v57 = vld [vmem:[%s2560_s7 + $0x1] sm:$0x1] }
 0x136   :  { %1306 = vmatpush3.msra.mxu1 %v627_v58 }
 0x137   :  { %1307 = vmatprep.subr.mxu1 %v642_v10 }
 0x138   :  { %1308 = vmatpush3.msra.mxu1 %v626_v12 }
 0x139   :  { %1309 = vmatprep.subr.mxu1 %v641_v16 }
 0x13a   :  { %1310 = vmatpush3.msra.mxu1 %v625_v17 }
 0x13b   :  { %1311 = vmatprep.subr.mxu1 %v640_v20 }
 0x13c   :  { %1312 = vmatpush3.msra.mxu1 %v624_v26 }
 0x13d   :  { %1313 = vmatprep.subr.mxu1 %v639_v27 }
 0x13e   :  { %1314 = vmatpush3.msra.mxu1 %v623_v28 }
 0x13f   :  { %1315 = vmatprep.subr.mxu1 %v638_v30 }
 0x140   :  { %1316 = vmatpush3.msra.mxu1 %v622_v31 }
 0x141   :  { %1317 = vmatprep.subr.mxu1 %v637_v32 }
 0x142   :  { %1318 = vmatpush3.msra.mxu1 %v621_v33 }
 0x143   :  { %1319 = vmatprep.subr.mxu1 %v636_v34 }
 0x144   :  { %1320 = vmatpush3.msra.mxu1 %v620_v35 }
 0x145   :  { %1321 = vmatprep.subr.mxu1 %v635_v36  ;;  %v514_v36 = vld [vmem:[%s2561_s4] sm:$0xff] }
 0x146   :  { %1322 = vmatpush3.msra.mxu1 %v619_v37  ;;  %v515_v37 = vld [vmem:[%s2561_s4 + $0x8] sm:$0xff] }
 0x147   :  { %1323 = vmatprep.subr.mxu1 %v634_v38  ;;  %v662_v38 = vld [vmem:[%s2559_s5 + $0x178] sm:$0xff] }
 0x148   :  { %1324 = vmatpush3.msra.mxu1 %v618_v39  ;;  %v516_v39 = vld [vmem:[%s2561_s4 + $0x10] sm:$0xff] }
 0x149   :  { %1325 = vmatprep.subr.mxu1 %v633_v40  ;;  %v661_v40 = vld [vmem:[%s2559_s5 + $0x170] sm:$0xff] }
 0x14a   :  { %1326 = vmatpush3.msra.mxu1 %v617_v41  ;;  %v517_v41 = vld [vmem:[%s2561_s4 + $0x18] sm:$0xff] }
 0x14b   :  { %1327 = vmatprep.subr.mxu1 %v632_v42  ;;  %v660_v42 = vld [vmem:[%s2559_s5 + $0x168] sm:$0xff] }
 0x14c   :  { %1328 = vmatpush3.msra.mxu1 %v616_v43  ;;  %v659_v43 = vld [vmem:[%s2559_s5 + $0x160] sm:$0xff] }
 0x1cf   :  { %v308_v44 = vpop.f32.mrf.mxu1 }
 0x1d0   :  { %v312_v46 = vmul.f32 0.001953125, %v308_v44  ;;  %v658_v44 = vld [vmem:[%s2559_s5 + $0x158] sm:$0xff] }
 0x1d1   :  { %v1465_v45 = vpop.f32.mrf.mxu1 }
 0x1d2   :  { %v384_v48 = vmul.f32 %v312_v46, %v312_v46  ;;  %v657_v45 = vld [vmem:[%s2559_s5 + $0x150] sm:$0xff] }
 0x1ef   :  { %v379_v47 = vpop.f32.mrf.mxu1 }
 0x1f0   :  { %v383_v49 = vmul.f32 0.001953125, %v379_v47  ;;  %v655_v47 = vld [vmem:[%s2559_s5 + $0x140] sm:$0xff] }
 0x1f1   :  { %v1500_v50 = vpop.f32.mrf.mxu1 }
 0x1f2   :  { %v385_v51 = vsub.f32 %v383_v49, %v384_v48  ;;  %v654_v48 = vld [vmem:[%s2559_s5 + $0x138] sm:$0xff]  ;;  %v653_v49 = vld [vmem:[%s2559_s5 + $0x130] sm:$0xff]  ;;  %v652_v50 = vld [vmem:[%s2559_s5 + $0x128] sm:$0xff] }
 0x1f4   :  { %v386_v52 = vmax.f32 %v385_v51, 0.0  ;;  %v631_v51 = vld [vmem:[%s2559_s5 + $0x80] sm:$0xff] }
 0x1f5   :  { %1329 = vmatprep.subr.mxu1 %v631_v51 }
 0x1f6   :  { %v387_v53 = vadd.f32 1e-05, %v386_v52  ;;  %v615_v52 = vld [vmem:[%s2559_s5] sm:$0xff] }
 0x1f7   :  { %1330 = vmatpush3.msra.mxu1 %v615_v52 }
 0x1f8   :  { %1709 = vrsqrt.f32 %v387_v53  ;;  %v651_v53 = vld [vmem:[%s2559_s5 + $0x120] sm:$0xff]  ;;  %1567 = vmatprep.subr.mxu1 %v1715_v3 }
 0x205   :  { %v1710_v55 = vpop.eup %1709 }
 0x206   :  { %v389_v56 = vmul.f32 %v1710_v55, %v202_v54  ;;  %v650_v54 = vld [vmem:[%s2559_s5 + $0x118] sm:$0xff]  ;;  %v649_v55 = vld [vmem:[%s2559_s5 + $0x110] sm:$0xff] }
 0x208   :  { %v390_v58 = vmul.f32 %v389_v56, %v312_v46  ;;  %v395_v10 = vrot.slane %v389_v56, %v2057_v13  ;;  %v656_v46 = vld [vmem:[%s2559_s5 + $0x148] sm:$0xff] }
 0x209   :  { %v648_v56 = vld [vmem:[%s2559_s5 + $0x108] sm:$0xff] }
 0x20a   :  { %v391_v12 = vsub.f32 %v203_v57, %v390_v58  ;;  %v399_v16 = vmul.f32 %v395_v10, %v2081_v29  ;;  %v396_v20 = vmul.f32 %v395_v10, %v2072_v21  ;;  %v398_v26 = vmul.f32 %v395_v10, %v2074_v22  ;;  %v414_v22 = vld [vmem:[%s2558_s3 + $0x10] sm:$0xff]  ;;  %v415_v29 = vld [vmem:[%s2558_s3 + $0x18] sm:$0xff]  ;;  %v647_v57 = vld [vmem:[%s2559_s5 + $0x100] sm:$0xff] }
 0x20b   :  { %v397_v31 = vmul.f32 %v395_v10, %v2070_v19  ;;  %v413_v19 = vld [vmem:[%s2558_s3 + $0x8] sm:$0xff]  ;;  %v96_v58 = vsub.s32 1, %v2054_v11  ;;  %v199_v10 = vpop.f32.mrf.mxu0 }
 0x20c   :  { %v403_v17 = vrot.slane %v391_v12, %v2057_v13 }
 0x20e   :  { %v407_v27 = vadd.f32 %v403_v17, %v399_v16  ;;  %v404_v28 = vadd.f32 %v403_v17, %v396_v20  ;;  %v406_v30 = vadd.f32 %v403_v17, %v398_v26  ;;  %v405_v34 = vadd.f32 %v403_v17, %v397_v31 }
 0x20f   :  { %v97_v16 = vrot.slane %v2062_v14, %v96_v58 }
 0x210   :  { %v2231_v32 = vmax.f32 %v407_v27, 0.0  ;;  %v408_v33 = vmax.f32 %v404_v28, 0.0  ;;  %v2234_v35 = vmax.f32 %v406_v30, 0.0  ;;  %v2238_v21 = vmax.f32 %v405_v34, 0.0 }
 0x211   :  { %v2336_v20 = vadd.f32 %v2068_v18, %v97_v16  ;;  %v2342_v27 = vadd.f32 %v2064_v15, %v97_v16  ;;  %v2345_v11 = vadd.f32 %v2076_v24, %v97_v16  ;;  %v2351_v28 = vadd.f32 %v199_v10, %v97_v16 }
 0x212   :  { %1501 = vmatprep.subr.mxu0 %v2231_v32  ;;  %734 = vmatprep.mubr.f32.mxu1 %v408_v33 }
 0x213   :  { %1502 = vmatpush3.msra.mxu0 %v2231_v32  ;;  %v842_v18 = vadd.f32 %v2336_v20, %v2342_v27  ;;  %v852_v34 = vmul.f32 %v2336_v20, %v2336_v20 }
 0x214   :  { %1503 = vmatprep.subr.mxu0 %v2234_v35 }
 0x215   :  { %1504 = vmatpush3.msra.mxu0 %v2234_v35  ;;  %v843_v15 = vadd.f32 %v842_v18, %v2345_v11 }
 0x216   :  { %1505 = vmatprep.subr.mxu0 %v2238_v21 }
 0x217   :  { %1506 = vmatpush3.msra.mxu0 %v2238_v21  ;;  %v844_v31 = vadd.f32 %v843_v15, %v2351_v28 }
 0x218   :  { %1507 = vmatprep.subr.mxu0 %v408_v33 }
 0x219   :  { %1508 = vmatpush3.msra.mxu0 %v408_v33 }
 0x21a   :  { %1510 = vmatmul.mubr.msk.f32.vlgmr.msra.gmra.mxu0 %vm416_vm2, %v413_v19  ;;  %1515 = vmatprep.subr.mxu0 %v2231_v32  ;;  %v853_v19 = vmul.f32 %v2345_v11, %v2345_v11 }
 0x21b   :  { %1516 = vmatpush3.msra.mxu0 %v2231_v32  ;;  %1512 = vmatprep.mubr.msk.f32.mxu0 %vm416_vm2, %v414_v22  ;;  %v845_v22 = vrot.slane %v844_v31, 4 }
 0x21c   :  { %1517 = vmatprep.subr.mxu0 %v2234_v35 }
 0x21d   :  { %1518 = vmatpush3.msra.mxu0 %v2234_v35 }
 0x21e   :  { %1513 = vmatmul.mubr.msk.f32.gmra.mxu0 %vm416_vm2, %v415_v29  ;;  %1519 = vmatprep.subr.mxu0 %v2238_v21  ;;  %v854_v29 = vmul.f32 %v2351_v28, %v2351_v28 }
 0x21f   :  { %1520 = vmatpush3.msra.mxu0 %v2238_v21  ;;  %1523 = vmatprep.mubr.msk.f32.mxu0 %vm416_vm2, %v514_v36 }
 0x220   :  { %1521 = vmatprep.subr.mxu0 %v408_v33 }
 0x221   :  { %1522 = vmatpush3.msra.mxu0 %v408_v33 }
 0x222   :  { %1524 = vmatmul.mubr.msk.f32.vlgmr.msra.gmra.mxu0 %vm416_vm2, %v515_v37  ;;  %1529 = vmatprep.subr.mxu0 %v662_v38  ;;  %v846_v37 = vadd.f32 %v845_v22, %v844_v31 }
 0x223   :  { %1526 = vmatprep.mubr.msk.f32.mxu0 %vm416_vm2, %v516_v39  ;;  %1530 = vmatpush3.msra.mxu0 %v662_v38 }
 0x224   :  { %1531 = vmatprep.subr.mxu0 %v661_v40  ;;  %v847_v39 = vrot.slane %v846_v37, 2 }
 0x225   :  { %1532 = vmatpush3.msra.mxu0 %v661_v40 }
 0x226   :  { %1527 = vmatmul.mubr.msk.f32.gmra.mxu0 %vm416_vm2, %v517_v41  ;;  %1533 = vmatprep.subr.mxu0 %v660_v42  ;;  %v848_v41 = vadd.f32 %v847_v39, %v846_v37 }
 0x227   :  { %1534 = vmatpush3.msra.mxu0 %v660_v42 }
 0x228   :  { %1535 = vmatprep.subr.mxu0 %v659_v43 }
 0x229   :  { %1536 = vmatpush3.msra.mxu0 %v659_v43  ;;  %v849_v43 = vrot.slane %v848_v41, 1 }
 0x22a   :  { %1537 = vmatprep.subr.mxu0 %v658_v44 }
 0x22b   :  { %1538 = vmatpush3.msra.mxu0 %v658_v44 }
 0x22c   :  { %1539 = vmatprep.subr.mxu0 %v657_v45 }
 0x22d   :  { %1540 = vmatpush3.msra.mxu0 %v657_v45  ;;  %v850_v45 = vadd.f32 %v849_v43, %v848_v41 }
 0x22e   :  { %1541 = vmatprep.subr.mxu0 %v656_v46 }
 0x22f   :  { %1542 = vmatpush3.msra.mxu0 %v656_v46 }
 0x230   :  { %1543 = vmatprep.subr.mxu0 %v655_v47 }
 0x231   :  { %1544 = vmatpush3.msra.mxu0 %v655_v47 }
 0x232   :  { %1545 = vmatprep.subr.mxu0 %v654_v48 }
 0x233   :  { %1546 = vmatpush3.msra.mxu0 %v654_v48 }
 0x234   :  { %1547 = vmatprep.subr.mxu0 %v653_v49 }
 0x235   :  { %1548 = vmatpush3.msra.mxu0 %v653_v49 }
 0x236   :  { %1549 = vmatprep.subr.mxu0 %v652_v50 }
 0x237   :  { %1550 = vmatpush3.msra.mxu0 %v652_v50 }
 0x238   :  { %1551 = vmatprep.subr.mxu0 %v651_v53 }
 0x239   :  { %1552 = vmatpush3.msra.mxu0 %v651_v53 }
 0x23a   :  { %1553 = vmatprep.subr.mxu0 %v650_v54 }
 0x23b   :  { %1554 = vmatpush3.msra.mxu0 %v650_v54 }
 0x23c   :  { %1555 = vmatprep.subr.mxu0 %v649_v55 }
 0x23d   :  { %1556 = vmatpush3.msra.mxu0 %v649_v55 }
 0x23e   :  { %1557 = vmatprep.subr.mxu0 %v648_v56 }
 0x23f   :  { %1558 = vmatpush3.msra.mxu0 %v648_v56 }
 0x240   :  { %1559 = vmatprep.subr.mxu0 %v647_v57 }
 0x241   :  { %1560 = vmatpush3.msra.mxu0 %v647_v57 }
 0x242   :  { %1602 = vmatprep.subr.mxu0 %v1715_v3 }
 0x2da   :  { %v1511_v12 = vpop.f32.mrf.mxu0 }
 0x2dc   :  { %v495_v17 = vpop.f32.mrf.mxu0 }
 0x2dd   :  { %735 = vmatmul.mubr.f32.vlgmr.msra.gmra.mxu1 %v495_v17 }
 0x2de   :  { %1568 = vmatpush3.msra.mxu1 %v1838_v23  ;;  %v1514_v26 = vpop.f32.mrf.mxu0  ;;  %739 = vmatprep.mubr.f32.mxu1 %v2238_v21  ;;  %v851_v21 = vmul.f32 %v2342_v27, %v2342_v27 }
 0x2df   :  { %1569 = vmatprep.subr.mxu1 %v1715_v3 }
 0x2e0   :  { %1570 = vmatpush3.msra.mxu1 %v1847_v25  ;;  %v505_v14 = vpop.f32.mrf.mxu0 }
 0x2e1   :  { %1571 = vmatprep.subr.mxu1 %v1715_v3  ;;  %740 = vmatmul.mubr.f32.gmra.mxu1 %v1511_v12 }
 0x2e2   :  { %1572 = vmatpush3.msra.mxu1 %v1957_v59  ;;  %v1525_v30 = vpop.f32.mrf.mxu0  ;;  %744 = vmatprep.mubr.f32.mxu1 %v2234_v35 }
 0x2e3   :  { %1573 = vmatprep.subr.mxu1 %v1715_v3 }
 0x2e4   :  { %1574 = vmatpush3.msra.mxu1 %v1964_v60  ;;  %v596_v24 = vpop.f32.mrf.mxu0 }
 0x2e5   :  { %1575 = vmatprep.subr.mxu1 %v1715_v3  ;;  %745 = vmatmul.mubr.f32.gmra.mxu1 %v505_v14 }
 0x2e6   :  { %1561 = vmatprep.mubr.f32.mxu0 %v596_v24  ;;  %1576 = vmatpush3.msra.mxu1 %v1971_v61  ;;  %v1528_v33 = vpop.f32.mrf.mxu0 }
 0x2e7   :  { %749 = vmatprep.mubr.f32.mxu1 %v2231_v32  ;;  %1562 = vmatmul.mubr.f32.vlgmr.msra.gmra.mxu0 %v1525_v30  ;;  %v855_v32 = vadd.f32 %v852_v34, %v851_v21 }
 0x2e8   :  { %1577 = vmatprep.subr.mxu1 %v1715_v3  ;;  %1603 = vmatpush3.msra.mxu0 %v1838_v23  ;;  %v606_v35 = vpop.f32.mrf.mxu0 }
 0x2e9   :  { %1578 = vmatpush3.msra.mxu1 %v1978_v62  ;;  %1604 = vmatprep.subr.mxu0 %v1715_v3  ;;  %v856_v36 = vadd.f32 %v855_v32, %v853_v19 }
 0x2ea   :  { %1579 = vmatprep.subr.mxu1 %v1715_v3  ;;  %1605 = vmatpush3.msra.mxu0 %v1847_v25 }
 0x2eb   :  { %750 = vmatmul.mubr.f32.gmra.mxu1 %v1514_v26  ;;  %1564 = vmatprep.mubr.f32.mxu0 %v606_v35  ;;  %v857_v38 = vadd.f32 %v856_v36, %v854_v29 }
 0x2ec   :  { %1580 = vmatpush3.msra.mxu1 %v1985_v63  ;;  %1606 = vmatprep.subr.mxu0 %v1715_v3 }
 0x2ed   :  { %1565 = vmatmul.mubr.f32.gmra.mxu0 %v1528_v33  ;;  %1581 = vmatprep.subr.mxu1 %v1715_v3  ;;  %v858_v40 = vrot.slane %v857_v38, 4 }
 0x2ee   :  { %1607 = vmatpush3.msra.mxu0 %v1957_v59  ;;  %1582 = vmatpush3.msra.mxu1 %v1992_v0 }
 0x2ef   :  { %1608 = vmatprep.subr.mxu0 %v1715_v3  ;;  %1583 = vmatprep.subr.mxu1 %v1715_v3  ;;  %v859_v42 = vadd.f32 %v858_v40, %v857_v38 }
 0x2f0   :  { %1609 = vmatpush3.msra.mxu0 %v1964_v60  ;;  %1584 = vmatpush3.msra.mxu1 %v1999_v1 }
 0x2f1   :  { %1610 = vmatprep.subr.mxu0 %v1715_v3  ;;  %1585 = vmatprep.subr.mxu1 %v1715_v3  ;;  %v860_v44 = vrot.slane %v859_v42, 2 }
 0x2f2   :  { %1611 = vmatpush3.msra.mxu0 %v1971_v61  ;;  %1586 = vmatpush3.msra.mxu1 %v2006_v2 }
 0x2f3   :  { %1612 = vmatprep.subr.mxu0 %v1715_v3  ;;  %1587 = vmatprep.subr.mxu1 %v1715_v3  ;;  %v861_v46 = vadd.f32 %v860_v44, %v859_v42 }
 0x2f4   :  { %1613 = vmatpush3.msra.mxu0 %v1978_v62  ;;  %1588 = vmatpush3.msra.mxu1 %v2013_v4 }
 0x2f5   :  { %1614 = vmatprep.subr.mxu0 %v1715_v3  ;;  %1589 = vmatprep.subr.mxu1 %v1715_v3  ;;  %v862_v47 = vrot.slane %v861_v46, 1 }
 0x2f6   :  { %1615 = vmatpush3.msra.mxu0 %v1985_v63  ;;  %1590 = vmatpush3.msra.mxu1 %v2020_v5 }
 0x2f7   :  { %1616 = vmatprep.subr.mxu0 %v1715_v3  ;;  %1591 = vmatprep.subr.mxu1 %v1715_v3  ;;  %v863_v48 = vadd.f32 %v862_v47, %v861_v46  ;;  %v840_v47 = vld [vmem:[%s2560_s7 + $0x2] sm:$0x1] }
 0x2f8   :  { %1617 = vmatpush3.msra.mxu0 %v1992_v0  ;;  %1592 = vmatpush3.msra.mxu1 %v2027_v6 }
 0x2f9   :  { %1618 = vmatprep.subr.mxu0 %v1715_v3  ;;  %1593 = vmatprep.subr.mxu1 %v1715_v3 }
 0x2fa   :  { %1619 = vmatpush3.msra.mxu0 %v1999_v1  ;;  %1594 = vmatpush3.msra.mxu1 %v2034_v7 }
 0x2fb   :  { %1620 = vmatprep.subr.mxu0 %v1715_v3  ;;  %1595 = vmatprep.subr.mxu1 %v1715_v3 }
 0x2fc   :  { %1621 = vmatpush3.msra.mxu0 %v2006_v2  ;;  %1596 = vmatpush3.msra.mxu1 %v2041_v8 }
 0x2fd   :  { %1622 = vmatprep.subr.mxu0 %v1715_v3  ;;  %1597 = vmatprep.subr.mxu1 %v1715_v3 }
 0x2fe   :  { %1623 = vmatpush3.msra.mxu0 %v2013_v4  ;;  %1598 = vmatpush3.msra.mxu1 %v2048_v9 }
 0x2ff   :  { %1599 = vmatprep.mubr.msk.f32.mxu1 %vm1716_vm1, %v1715_v3  ;;  %1624 = vmatprep.subr.mxu0 %v1715_v3 }
 0x300   :  { %1600 = vmatmul.mubr.f32.vlgmr.msra.gmra.mxu1 %v850_v45  ;;  %1625 = vmatpush3.msra.mxu0 %v2020_v5 }
 0x301   :  { %1626 = vmatprep.subr.mxu0 %v1715_v3  ;;  %1634 = vmatprep.mubr.msk.f32.mxu0 %vm1716_vm1, %v1715_v3 }
 0x302   :  { %1627 = vmatpush3.msra.mxu0 %v2027_v6  ;;  %1637 = vmatprep.subr.mxu1 %v1715_v3 }
 0x303   :  { %1628 = vmatprep.subr.mxu0 %v1715_v3  ;;  %1638 = vmatpush3.msra.mxu1 %v1838_v23 }
 0x304   :  { %1629 = vmatpush3.msra.mxu0 %v2034_v7  ;;  %1639 = vmatprep.subr.mxu1 %v1715_v3 }
 0x305   :  { %1630 = vmatprep.subr.mxu0 %v1715_v3  ;;  %1640 = vmatpush3.msra.mxu1 %v1847_v25 }
 0x306   :  { %1631 = vmatpush3.msra.mxu0 %v2041_v8  ;;  %1641 = vmatprep.subr.mxu1 %v1715_v3 }
 0x307   :  { %1632 = vmatprep.subr.mxu0 %v1715_v3  ;;  %1642 = vmatpush3.msra.mxu1 %v1957_v59 }
 0x308   :  { %1633 = vmatpush3.msra.mxu0 %v2048_v9  ;;  %1643 = vmatprep.subr.mxu1 %v1715_v3 }
 0x309   :  { %1635 = vmatmul.mubr.f32.vlgmr.msra.gmra.mxu0 %v863_v48  ;;  %1672 = vmatprep.subr.mxu0 %v1715_v3 }
 0x30a   :  { %1673 = vmatpush3.msra.mxu0 %v1838_v23  ;;  %1644 = vmatpush3.msra.mxu1 %v1964_v60 }
 0x30b   :  { %1674 = vmatprep.subr.mxu0 %v1715_v3  ;;  %1645 = vmatprep.subr.mxu1 %v1715_v3 }
 0x30c   :  { %1675 = vmatpush3.msra.mxu0 %v1847_v25  ;;  %1646 = vmatpush3.msra.mxu1 %v1971_v61 }
 0x30d   :  { %1676 = vmatprep.subr.mxu0 %v1715_v3  ;;  %1647 = vmatprep.subr.mxu1 %v1715_v3 }
 0x30e   :  { %1677 = vmatpush3.msra.mxu0 %v1957_v59  ;;  %1648 = vmatpush3.msra.mxu1 %v1978_v62 }
 0x30f   :  { %1678 = vmatprep.subr.mxu0 %v1715_v3  ;;  %1649 = vmatprep.subr.mxu1 %v1715_v3 }
 0x310   :  { %1679 = vmatpush3.msra.mxu0 %v1964_v60  ;;  %1650 = vmatpush3.msra.mxu1 %v1985_v63 }
 0x311   :  { %1680 = vmatprep.subr.mxu0 %v1715_v3  ;;  %1651 = vmatprep.subr.mxu1 %v1715_v3 }
 0x312   :  { %1681 = vmatpush3.msra.mxu0 %v1971_v61  ;;  %1652 = vmatpush3.msra.mxu1 %v1992_v0 }
 0x313   :  { %1682 = vmatprep.subr.mxu0 %v1715_v3  ;;  %1653 = vmatprep.subr.mxu1 %v1715_v3 }
 0x314   :  { %1683 = vmatpush3.msra.mxu0 %v1978_v62  ;;  %1654 = vmatpush3.msra.mxu1 %v1999_v1 }
 0x315   :  { %1684 = vmatprep.subr.mxu0 %v1715_v3  ;;  %1655 = vmatprep.subr.mxu1 %v1715_v3 }
 0x316   :  { %1685 = vmatpush3.msra.mxu0 %v1985_v63  ;;  %1656 = vmatpush3.msra.mxu1 %v2006_v2 }
 0x317   :  { %1686 = vmatprep.subr.mxu0 %v1715_v3  ;;  %1657 = vmatprep.subr.mxu1 %v1715_v3 }
 0x318   :  { %1687 = vmatpush3.msra.mxu0 %v1992_v0  ;;  %1658 = vmatpush3.msra.mxu1 %v2013_v4  ;;  %v1248_v0 = vld [vmem:[%s2562_s6] ss:$0 sm:$0xff] }
 0x319   :  { %1688 = vmatprep.subr.mxu0 %v1715_v3  ;;  %1659 = vmatprep.subr.mxu1 %v1715_v3 }
 0x31a   :  { %1689 = vmatpush3.msra.mxu0 %v1999_v1  ;;  %1660 = vmatpush3.msra.mxu1 %v2020_v5 }
 0x31b   :  { %1690 = vmatprep.subr.mxu0 %v1715_v3  ;;  %1661 = vmatprep.subr.mxu1 %v1715_v3 }
 0x31c   :  { %1691 = vmatpush3.msra.mxu0 %v2006_v2  ;;  %1662 = vmatpush3.msra.mxu1 %v2027_v6 }
 0x31d   :  { %1692 = vmatprep.subr.mxu0 %v1715_v3  ;;  %1663 = vmatprep.subr.mxu1 %v1715_v3 }
 0x31e   :  { %1693 = vmatpush3.msra.mxu0 %v2013_v4  ;;  %1664 = vmatpush3.msra.mxu1 %v2034_v7 }
 0x31f   :  { %1694 = vmatprep.subr.mxu0 %v1715_v3  ;;  %1665 = vmatprep.subr.mxu1 %v1715_v3 }
 0x320   :  { %1695 = vmatpush3.msra.mxu0 %v2020_v5  ;;  %1666 = vmatpush3.msra.mxu1 %v2041_v8 }
 0x321   :  { %1696 = vmatprep.subr.mxu0 %v1715_v3  ;;  %1667 = vmatprep.subr.mxu1 %v1715_v3 }
 0x322   :  { %1697 = vmatpush3.msra.mxu0 %v2027_v6  ;;  %1668 = vmatpush3.msra.mxu1 %v2048_v9 }
 0x323   :  { %1698 = vmatprep.subr.mxu0 %v1715_v3  ;;  %1669 = vmatprep.mubr.msk.f32.mxu1 %vm1716_vm1, %v1715_v3 }
 0x324   :  { %1699 = vmatpush3.msra.mxu0 %v2034_v7  ;;  %1704 = vmatprep.mubr.msk.f32.mxu0 %vm1716_vm1, %v1715_v3 }
 0x325   :  { %1700 = vmatprep.subr.mxu0 %v1715_v3 }
 0x326   :  { %1701 = vmatpush3.msra.mxu0 %v2041_v8 }
 0x327   :  { %1702 = vmatprep.subr.mxu0 %v1715_v3 }
 0x328   :  { %1703 = vmatpush3.msra.mxu0 %v2048_v9 }
 0x39d   :  { %v1331_v23 = vpop.f32.mrf.mxu1 }
 0x39f   :  { %v1332_v25 = vpop.f32.mrf.mxu1 }
 0x3a0   :  { %v1333_v61 = vadd.f32 %v1332_v25, %v1331_v23  ;;  %v841_v25 = vld [vmem:[%s2560_s7 + $0x3] sm:$0x1] }
 0x3a1   :  { %v1334_v59 = vpop.f32.mrf.mxu1 }
 0x3a2   :  { %v737_v6 = vadd.f32 %v1333_v61, %v1248_v0 }
 0x3a3   :  { %v1335_v60 = vpop.f32.mrf.mxu1 }
 0x3a4   :  { %v1336_v62 = vadd.f32 %v1335_v60, %v1334_v59 }
 0x3a5   :  { %v1337_v63 = vpop.f32.mrf.mxu1 }
 0x3a6   :  { %v742_v1 = vadd.f32 %v1336_v62, %v1248_v0 }
 0x3a7   :  { %v1563_v2 = vpop.f32.mrf.mxu0  ;;  %v1338_v4 = vpop.f32.mrf.mxu1 }
 0x3a8   :  { %v1339_v5 = vadd.f32 %v1338_v4, %v1337_v63  ;;  %v2498_v3 = vadd.f32 %v1563_v2, %v742_v1 }
 0x3a9   :  { %v821_v7 = vpop.f32.mrf.mxu0 }
 0x3aa   :  { %v2500_v8 = vadd.f32 %v821_v7, %v737_v6  ;;  %v747_v49 = vadd.f32 %v1339_v5, %v1248_v0  ;;  %v1026_v52 = vmul.f32 %v2498_v3, %v2498_v3 }
 0x3ab   :  { %v1340_v9 = vpop.f32.mrf.mxu1 }
 0x3ac   :  { %v1025_v53 = vmul.f32 %v2500_v8, %v2500_v8  ;;  %v1016_v56 = vadd.f32 %v2498_v3, %v2500_v8 }
 0x3ad   :  { %v1566_v50 = vpop.f32.mrf.mxu0  ;;  %v1341_v51 = vpop.f32.mrf.mxu1 }
 0x3ae   :  { %v1342_v54 = vadd.f32 %v1341_v51, %v1340_v9  ;;  %v1029_v10 = vadd.f32 %v1026_v52, %v1025_v53 }
 0x3af   :  { %v831_v55 = vpop.f32.mrf.mxu0 }
 0x3b0   :  { %v752_v57 = vadd.f32 %v1342_v54, %v1248_v0  ;;  %v2508_v58 = vadd.f32 %v831_v55, %v747_v49 }
 0x3b2   :  { %v2510_v12 = vadd.f32 %v1566_v50, %v752_v57  ;;  %v1017_v16 = vadd.f32 %v1016_v56, %v2508_v58  ;;  %v1027_v17 = vmul.f32 %v2508_v58, %v2508_v58  ;;  %v1015_v57 = vld [vmem:[%s2560_s7 + $0x5] sm:$0x1] }
 0x3b4   :  { %v1028_v26 = vmul.f32 %v2510_v12, %v2510_v12  ;;  %v1018_v14 = vadd.f32 %v1017_v16, %v2510_v12  ;;  %v1030_v18 = vadd.f32 %v1029_v10, %v1027_v17 }
 0x3b6   :  { %v1019_v30 = vrot.slane %v1018_v14, 4  ;;  %v1031_v15 = vadd.f32 %v1030_v18, %v1028_v26 }
 0x3b8   :  { %v1020_v24 = vadd.f32 %v1019_v30, %v1018_v14  ;;  %v1032_v31 = vrot.slane %v1031_v15, 4 }
 0x3ba   :  { %v1021_v33 = vrot.slane %v1020_v24, 2  ;;  %v1033_v34 = vadd.f32 %v1032_v31, %v1031_v15 }
 0x3bc   :  { %v1022_v35 = vadd.f32 %v1021_v33, %v1020_v24  ;;  %v1034_v21 = vrot.slane %v1033_v34, 2 }
 0x3be   :  { %v1023_v19 = vrot.slane %v1022_v35, 1  ;;  %v1035_v22 = vadd.f32 %v1034_v21, %v1033_v34 }
 0x3c0   :  { %v930_v32 = vpop.f32.mrf.mxu1  ;;  %v1024_v29 = vadd.f32 %v1023_v19, %v1022_v35  ;;  %v1036_v36 = vrot.slane %v1035_v22, 1 }
 0x3c1   :  { %v934_v39 = vmul.f32 0.001953125, %v930_v32 }
 0x3c2   :  { %v1601_v37 = vpop.f32.mrf.mxu1  ;;  %1670 = vmatmul.mubr.f32.vlgmr.msra.gmra.mxu1 %v1024_v29  ;;  %v1037_v38 = vadd.f32 %v1036_v36, %v1035_v22 }
 0x3c3   :  { %v1006_v41 = vmul.f32 %v934_v39, %v934_v39 }
 0x3c4   :  { %1705 = vmatmul.mubr.f32.vlgmr.msra.gmra.mxu0 %v1037_v38 }
 0x3c9   :  { %v1001_v40 = vpop.f32.mrf.mxu0 }
 0x3ca   :  { %v1005_v42 = vmul.f32 0.001953125, %v1001_v40 }
 0x3cb   :  { %v1636_v43 = vpop.f32.mrf.mxu0 }
 0x3cc   :  { %v1007_v44 = vsub.f32 %v1005_v42, %v1006_v41 }
 0x3ce   :  { %v1008_v45 = vmax.f32 %v1007_v44, 0.0 }
 0x3d0   :  { %v1009_v46 = vadd.f32 1e-05, %v1008_v45 }
 0x3d2   :  { %1711 = vrsqrt.f32 %v1009_v46 }
 0x3df   :  { %v1712_v48 = vpop.eup %1711 }
 0x3e0   :  { %v1011_v23 = vmul.f32 %v1712_v48, %v840_v47 }
 0x3e2   :  { %v1012_v59 = vmul.f32 %v1011_v23, %v934_v39  ;;  %v1207_v60 = vrot.slane %v1011_v23, %v2057_v13 }
 0x3e4   :  { %v1013_v61 = vsub.f32 %v841_v25, %v1012_v59  ;;  %v1208_v62 = vmul.f32 %v1207_v60, %v2342_v27  ;;  %v1209_v63 = vmul.f32 %v1207_v60, %v2336_v20  ;;  %v1210_v0 = vmul.f32 %v1207_v60, %v2345_v11  ;;  %v1014_v11 = vld [vmem:[%s2560_s7 + $0x4] sm:$0x1] }
 0x3e5   :  { %v1211_v1 = vmul.f32 %v1207_v60, %v2351_v28 }
 0x3e6   :  { %v1215_v2 = vrot.slane %v1013_v61, %v2057_v13 }
 0x3e8   :  { %v1216_v4 = vadd.f32 %v1215_v2, %v1208_v62  ;;  %v1217_v5 = vadd.f32 %v1215_v2, %v1209_v63  ;;  %v1218_v6 = vadd.f32 %v1215_v2, %v1210_v0  ;;  %v1219_v7 = vadd.f32 %v1215_v2, %v1211_v1 }
 0x482   :  { %v1104_v9 = vpop.f32.mrf.mxu1 }
 0x483   :  { %v1108_v49 = vmul.f32 0.001953125, %v1104_v9 }
 0x484   :  { %v1671_v50 = vpop.f32.mrf.mxu1  ;;  %v1175_v51 = vpop.f32.mrf.mxu0 }
 0x485   :  { %v1180_v52 = vmul.f32 %v1108_v49, %v1108_v49  ;;  %v1179_v53 = vmul.f32 0.001953125, %v1175_v51 }
 0x486   :  { %v1706_v54 = vpop.f32.mrf.mxu0 }
 0x487   :  { %v1181_v27 = vsub.f32 %v1179_v53, %v1180_v52 }
 0x489   :  { %v1182_v55 = vmax.f32 %v1181_v27, 0.0 }
 0x48b   :  { %v1183_v20 = vadd.f32 1e-05, %v1182_v55 }
 0x48d   :  { %1713 = vrsqrt.f32 %v1183_v20 }
 0x49a   :  { %v1714_v28 = vpop.eup %1713 }
 0x49b   :  { %v1185_v56 = vmul.f32 %v1714_v28, %v1014_v11 }
 0x49d   :  { %v1186_v10 = vmul.f32 %v1185_v56, %v1108_v49  ;;  %v1191_v16 = vrot.slane %v1185_v56, %v2057_v13 }
 0x49f   :  { %v1187_v17 = vsub.f32 %v1015_v57, %v1186_v10  ;;  %v1192_v26 = vmul.f32 %v1191_v16, %v2500_v8  ;;  %v1193_v14 = vmul.f32 %v1191_v16, %v2498_v3  ;;  %v1194_v18 = vmul.f32 %v1191_v16, %v2508_v58 }
 0x4a0   :  { %v1195_v30 = vmul.f32 %v1191_v16, %v2510_v12 }
 0x4a1   :  { %v1199_v15 = vrot.slane %v1187_v17, %v2057_v13 }
 0x4a3   :  { %v1200_v24 = vadd.f32 %v1199_v15, %v1192_v26  ;;  %v1201_v31 = vadd.f32 %v1199_v15, %v1193_v14  ;;  %v1202_v33 = vadd.f32 %v1199_v15, %v1194_v18  ;;  %v1203_v34 = vadd.f32 %v1199_v15, %v1195_v30 }
 0x4a5   :  { %v1220_v35 = vadd.f32 %v1216_v4, %v1200_v24  ;;  %v1221_v21 = vadd.f32 %v1217_v5, %v1201_v31  ;;  %v1222_v19 = vadd.f32 %v1218_v6, %v1202_v33  ;;  %v1223_v22 = vadd.f32 %v1219_v7, %v1203_v34 }
 0x4a7   :  { %v1224_v32 = vmax.f32 %v1220_v35, 0.0  ;;  %v1225_v29 = vmax.f32 %v1221_v21, 0.0  ;;  %v1226_v36 = vmax.f32 %v1222_v19, 0.0  ;;  %v1227_v8 = vmax.f32 %v1223_v22, 0.0 }
 0x4a9   :  { %1228 = vst [vmem:[%s2563_s9] sm:$0xff] %v1224_v32  ;;  %1229 = vst [vmem:[%s2563_s9 + $0x8] sm:$0xff] %v1225_v29 }
 0x4aa   :  { %1230 = vst [vmem:[%s2563_s9 + $0x10] sm:$0xff] %v1226_v36  ;;  %1231 = vst [vmem:[%s2563_s9 + $0x18] sm:$0xff] %v1227_v8 }

</bundles_post_ra>
